<compile_context>
chip_gen: v5e
topology: v5e:2x2
jax: 0.10.0
libtpu: 0.0.40
codegen_flags: <defaults>
</compile_context>

<pallas_src>
import jax
import jax.numpy as jnp
from jax.experimental import pallas as pl
from jax.experimental.pallas import tpu as pltpu


IMG_BLK = 8     # images per grid step -> (8,128)-aligned output block
HW_TILE = 128   # pixels per reduction step (resolution-independent block size)


def _round_up(x, m):
    return ((x + m - 1) // m) * m


# ---------------------------------------------------------------------------
# Fused Pallas kernel: conv(im2col matmul) + bias + ReLU + pooled-sum accumulate
# across HW tiles, then both linear heads in the last-tile epilogue.
# ---------------------------------------------------------------------------
def _pipe_fused_kernel(p_ref, w_ref, cb_ref, hw_ref, hb_ref, out_ref, acc_ref):
    # p_ref  : (IMG_BLK, HW_TILE, K) bf16  im2col patches, IMG_BLK images x one HW tile
    # w_ref  : (K, Cfp)              bf16  conv weight (resident across the grid)
    # cb_ref : (1, Cfp)              f32   conv bias (zero-padded)
    # hw_ref : (Cfp, NCp)            bf16  all heads concatenated, 1/HW pre-folded
    # hb_ref : (1, NCp)              f32   all head biases (zero-padded)
    # out_ref: (IMG_BLK, NCp)        f32   packed logits (lane-dense, (8,128) aligned)
    # acc_ref: (IMG_BLK, Cfp)        f32   running sum over pixels of ReLU(conv)
    t = pl.program_id(1)

    @pl.when(t == 0)
    def _init():
        acc_ref[...] = jnp.zeros_like(acc_ref)

    blk, hw_tile, k = p_ref.shape
    p = p_ref[...].reshape(blk * hw_tile, k)                              # layout-preserving
    y = jnp.dot(p, w_ref[...], preferred_element_type=jnp.float32)       # conv as matmul
    y = jnp.maximum(y + cb_ref[...], 0.0)                                 # bias + ReLU
    acc_ref[...] += y.reshape(blk, hw_tile, -1).sum(axis=1)               # partial GAP sums

    @pl.when(t == pl.num_programs(1) - 1)
    def _heads():
        feat = acc_ref[...].astype(hw_ref.dtype)                          # (IMG_BLK, Cfp) bf16
        out_ref[...] = (
            jnp.dot(feat, hw_ref[...], preferred_element_type=jnp.float32) + hb_ref[...]
        )


# ---------------------------------------------------------------------------
# Wrapper glue (plain JAX): bf16-native im2col + one-time weight prep
# ---------------------------------------------------------------------------
def _im2col_3x3_pad1_bf16(x):
    """x: [N, Cin, H, W] f32 -> patches [N, H*W, Cin*9] bf16 (channel-major per patch).

    Cast to bf16 FIRST and build directly at width K = Cin*9 (no separate pad/cast pass).
    """
    N, Cin, H, W = x.shape
    xb = x.astype(jnp.bfloat16)
    xp = jnp.pad(xb, ((0, 0), (0, 0), (1, 1), (1, 1)))
    taps = [xp[:, :, ky:ky + H, kx:kx + W] for ky in range(3) for kx in range(3)]
    patches = jnp.stack(taps, axis=2)                  # (N, Cin, 9, H, W)
    patches = patches.transpose(0, 3, 4, 1, 2)         # (N, H, W, Cin, 9)
    return patches.reshape(N, H * W, Cin * 9)


def prepare_pipe_params(conv_w, conv_b, heads, image_hw):
    """One-time weight prep: transpose / concat / pad / cast, outside the hot path."""
    Cf, Cin, kh, kw = conv_w.shape
    K = Cin * kh * kw
    Cfp = _round_up(Cf, 128)
    head_dims = tuple(int(hw.shape[0]) for hw, _ in heads)
    NC = sum(head_dims)
    NCp = _round_up(NC, 128)
    H, W = image_hw
    inv_hw = 1.0 / float(H * W)

    w_mat = conv_w.reshape(Cf, K).T                                        # (K, Cf)
    w_mat = jnp.zeros((K, Cfp), jnp.float32).at[:, :Cf].set(w_mat).astype(jnp.bfloat16)
    cb = jnp.zeros((1, Cfp), jnp.float32).at[0, :Cf].set(conv_b)

    # All heads fused into one (Cf, NC) matrix; 1/HW folded in so the kernel pools via SUM.
    hw_all = jnp.concatenate([hw for hw, _ in heads], axis=0).T * inv_hw   # (Cf, NC)
    hb_all = jnp.concatenate([hb for _, hb in heads], axis=0)              # (NC,)
    hw_pad = jnp.zeros((Cfp, NCp), jnp.float32).at[:Cf, :NC].set(hw_all).astype(jnp.bfloat16)
    hb_pad = jnp.zeros((1, NCp), jnp.float32).at[0, :NC].set(hb_all)

    return dict(conv_w_mat=w_mat, conv_b=cb, head_w=hw_pad, head_b=hb_pad,
                head_dims=head_dims, K=K, Cf=Cf, Cfp=Cfp, NCp=NCp, HW=H * W)


def _vmem_limit_bytes(img_blk, hw_tile, K, Cfp, NCp):
    """Explicit scoped-VMEM budget derived from the actual (lane-padded) block sizes."""
    lane = lambda d: _round_up(d, 128)
    patch_blk = img_blk * hw_tile * lane(K) * 2          # bf16 patch tile
    conv_w = _round_up(K, 16) * lane(Cfp) * 2
    conv_b = 8 * lane(Cfp) * 4
    head_w = Cfp * lane(NCp) * 2
    head_b = 8 * lane(NCp) * 4
    out_blk = img_blk * lane(NCp) * 4
    acc = img_blk * lane(Cfp) * 4
    y_tmp = img_blk * hw_tile * lane(Cfp) * 4            # conv activation intermediate
    total = 2 * (patch_blk + conv_w + conv_b + head_w + head_b + out_blk) + acc + y_tmp
    # Headroom for Mosaic-internal scratch / spills; never below the 32 MiB default.
    return int(min(max(4 * total, 32 * 1024 * 1024), 112 * 1024 * 1024))


def pipe_forward(x, pp):
    """Pipe.forward: feature = extractor(x); return [convert(feature) for convert in heads].

    Conv + ReLU + global-average-pool + both heads run in ONE fused Pallas kernel;
    the wrapper only builds bf16 im2col patches and slices the packed logit slab.
    """
    N, Cin, H, W = x.shape
    HW = H * W
    K, Cfp, NCp = pp["K"], pp["Cfp"], pp["NCp"]
    assert K == Cin * 9 and HW == pp["HW"]

    hw_tile = HW_TILE if HW % HW_TILE == 0 else HW
    Npad = _round_up(N, IMG_BLK)

    patches = _im2col_3x3_pad1_bf16(x)                   # (N, HW, K) bf16, built bf16-native
    if Npad != N:
        patches = jnp.pad(patches, ((0, Npad - N), (0, 0), (0, 0)))

    n_img_blk = Npad // IMG_BLK
    n_hw_tile = HW // hw_tile

    flops = Npad * HW * K * Cfp * 2 + Npad * Cfp * NCp * 2
    bytes_accessed = (patches.size * 2                    # bf16 patches
                      + pp["conv_w_mat"].size * 2 + pp["head_w"].size * 2
                      + (pp["conv_b"].size + pp["head_b"].size) * 4
                      + Npad * NCp * 4)                   # f32 packed logits out

    logits = pl.pallas_call(
        _pipe_fused_kernel,
        out_shape=jax.ShapeDtypeStruct((Npad, NCp), jnp.float32),
        grid_spec=pltpu.PrefetchScalarGridSpec(
            num_scalar_prefetch=0,
            grid=(n_img_blk, n_hw_tile),                  # (parallel, reduction-last)
            in_specs=[
                pl.BlockSpec((IMG_BLK, hw_tile, K), lambda b, t: (b, t, 0)),  # patch tile
                pl.BlockSpec((K, Cfp), lambda b, t: (0, 0)),    # conv weight (resident)
                pl.BlockSpec((1, Cfp), lambda b, t: (0, 0)),    # conv bias
                pl.BlockSpec((Cfp, NCp), lambda b, t: (0, 0)),  # fused head weights (bf16)
                pl.BlockSpec((1, NCp), lambda b, t: (0, 0)),    # fused head biases
            ],
            out_specs=pl.BlockSpec((IMG_BLK, NCp), lambda b, t: (b, 0)),  # (8,128) store
            scratch_shapes=[pltpu.VMEM((IMG_BLK, Cfp), jnp.float32)],     # pooled-sum acc
        ),
        compiler_params=pltpu.CompilerParams(
            dimension_semantics=("parallel", "arbitrary"),
            vmem_limit_bytes=_vmem_limit_bytes(IMG_BLK, hw_tile, K, Cfp, NCp)),
        cost_estimate=pl.CostEstimate(
            flops=flops, transcendentals=0, bytes_accessed=bytes_accessed),
    )(patches, pp["conv_w_mat"], pp["conv_b"], pp["head_w"], pp["head_b"])

    logits = logits[:N]
    # Split the packed slab back into the per-head outputs (Pipe's list branch).
    outs, off = [], 0
    for nc in pp["head_dims"]:
        outs.append(logits[:, off:off + nc])
        off += nc
    return outs


# ---------------------------------------------------------------------------
# Reference (plain JAX, f32) for correctness check
# ---------------------------------------------------------------------------
def pipe_forward_ref(x, params):
    y = jax.lax.conv_general_dilated(
        x, params["conv_w"], window_strides=(1, 1), padding=((1, 1), (1, 1)),
        dimension_numbers=("NCHW", "OIHW", "NCHW"))
    y = jax.nn.relu(y + params["conv_b"][None, :, None, None])
    feat = jnp.mean(y, axis=(2, 3))                      # (N, Cf)
    return [feat @ hw.T + hb for (hw, hb) in params["heads"]]


# ---------------------------------------------------------------------------
if __name__ == "__main__":
    key = jax.random.PRNGKey(0)
    # N=16 gives a 2-step "parallel" axis (both v7x TensorCores) with IMG_BLK=8.
    N, Cin, H, W = 16, 4, 16, 16
    Cf = 32
    n_classes = [8, 5]

    ks = jax.random.split(key, 2 + 2 * len(n_classes) + 1)
    conv_w = 0.1 * jax.random.normal(ks[0], (Cf, Cin, 3, 3), jnp.float32)
    conv_b = 0.1 * jax.random.normal(ks[1], (Cf,), jnp.float32)
    heads = []
    for i, nc in enumerate(n_classes):
        hw = 0.1 * jax.random.normal(ks[2 + 2 * i], (nc, Cf), jnp.float32)
        hb = 0.1 * jax.random.normal(ks[3 + 2 * i], (nc,), jnp.float32)
        heads.append((hw, hb))
    params = {"conv_w": conv_w, "conv_b": conv_b, "heads": heads}

    # One-time weight prep (transpose / concat / pad / bf16 cast / fold 1/HW).
    prepped = prepare_pipe_params(conv_w, conv_b, heads, image_hw=(H, W))

    x = jax.random.normal(ks[-1], (N, Cin, H, W), jnp.float32)

    outs = pipe_forward(x, prepped)
    outs = [jax.block_until_ready(o) for o in outs]

    refs = pipe_forward_ref(x, params)
    for o, r in zip(outs, refs):
        assert o.shape == r.shape and o.dtype == jnp.float32
        # bf16 patches / head weights / pooled feature with f32 accumulation ->
        # slightly looser tolerance vs the all-f32 reference.
        assert jnp.allclose(o, r, atol=3e-2, rtol=3e-2), "mismatch vs reference"

    print("KERNEL_OK")
</pallas_src>

<mosaic_0001>
module attributes {stable_mosaic.version = 11 : i64} {
  func.func @_pipe_fused_kernel(%arg0: i32, %arg1: i32, %arg2: memref<8x128x36xbf16, #tpu.memory_space<vmem>>, %arg3: memref<36x128xbf16, #tpu.memory_space<vmem>>, %arg4: memref<1x128xf32, #tpu.memory_space<vmem>>, %arg5: memref<128x128xbf16, #tpu.memory_space<vmem>>, %arg6: memref<1x128xf32, #tpu.memory_space<vmem>>, %arg7: memref<8x128xf32, #tpu.memory_space<vmem>>, %arg8: memref<8x128xf32, #tpu.memory_space<vmem>>) attributes {dimension_semantics = [#tpu.dimension_semantics<parallel>, #tpu.dimension_semantics<arbitrary>], iteration_bounds = array<i64: 2, 2>, scalar_prefetch = 0 : i64, scratch_operands = 1 : i64, tpu.core_type = #tpu.core_type<tc>, window_params = [{transform_indices = @transform_0, window_bounds = array<i64: 8, 128, 36>}, {pipeline_mode = #tpu.pipeline_mode<synchronous>, transform_indices = @transform_1, window_bounds = array<i64: 36, 128>}, {pipeline_mode = #tpu.pipeline_mode<synchronous>, transform_indices = @transform_2, window_bounds = array<i64: 1, 128>}, {pipeline_mode = #tpu.pipeline_mode<synchronous>, transform_indices = @transform_3, window_bounds = array<i64: 128, 128>}, {pipeline_mode = #tpu.pipeline_mode<synchronous>, transform_indices = @transform_4, window_bounds = array<i64: 1, 128>}, {transform_indices = @transform_5, window_bounds = array<i64: 8, 128>}]} {
    %c0_i32 = arith.constant 0 : i32
    %0 = arith.cmpi eq, %arg1, %c0_i32 : i32
    %1 = arith.extui %0 : i1 to i32
    %c0_i32_0 = arith.constant 0 : i32
    %2 = arith.cmpi ne, %1, %c0_i32_0 : i32
    scf.if %2 {
      %cst_14 = arith.constant 0.000000e+00 : f32
      %20 = vector.broadcast %cst_14 : f32 to vector<8x128xf32>
      %c0_15 = arith.constant 0 : index
      %c0_16 = arith.constant 0 : index
      %21 = vector.load %arg8[%c0_15, %c0_16] : memref<8x128xf32, #tpu.memory_space<vmem>>, vector<8x128xf32>
      tpu.vector_store %arg8[%c0_15, %c0_16], %20 {strides = array<i32>} : memref<8x128xf32, #tpu.memory_space<vmem>>, vector<8x128xf32>,
    } else {
    }
    %c0 = arith.constant 0 : index
    %c0_1 = arith.constant 0 : index
    %c0_2 = arith.constant 0 : index
    %3 = vector.load %arg2[%c0, %c0_1, %c0_2] : memref<8x128x36xbf16, #tpu.memory_space<vmem>>, vector<8x128x36xbf16>
    %4 = vector.shape_cast %3 : vector<8x128x36xbf16> to vector<1024x36xbf16>
    %c0_3 = arith.constant 0 : index
    %c0_4 = arith.constant 0 : index
    %5 = vector.load %arg3[%c0_3, %c0_4] : memref<36x128xbf16, #tpu.memory_space<vmem>>, vector<36x128xbf16>
    %cst = arith.constant dense<0.000000e+00> : vector<1024x128xf32>
    %6 = tpu.matmul %4, %5, %cst {dimension_numbers = #tpu.dot_dimension_numbers<[1], [0], [0], [1], [0, 0, 1, 1], [], []>} : vector<1024x36xbf16>, vector<36x128xbf16>, vector<1024x128xf32> -> vector<1024x128xf32>
    %c0_5 = arith.constant 0 : index
    %c0_6 = arith.constant 0 : index
    %7 = vector.load %arg4[%c0_5, %c0_6] : memref<1x128xf32, #tpu.memory_space<vmem>>, vector<1x128xf32>
    %8 = vector.broadcast %7 : vector<1x128xf32> to vector<1024x128xf32>
    %9 = arith.addf %6, %8 : vector<1024x128xf32>
    %cst_7 = arith.constant 0.000000e+00 : f32
    %10 = vector.broadcast %cst_7 : f32 to vector<1024x128xf32>
    %11 = arith.maximumf %9, %10 : vector<1024x128xf32>
    %c0_8 = arith.constant 0 : index
    %c0_9 = arith.constant 0 : index
    %12 = vector.load %arg8[%c0_8, %c0_9] : memref<8x128xf32, #tpu.memory_space<vmem>>, vector<8x128xf32>
    %13 = vector.shape_cast %11 : vector<1024x128xf32> to vector<8x128x128xf32>
    %cst_10 = arith.constant dense<0.000000e+00> : vector<8x128xf32>
    %14 = vector.multi_reduction <add>, %13, %cst_10 [1] : vector<8x128x128xf32> to vector<8x128xf32>
    %15 = arith.addf %12, %14 : vector<8x128xf32>
    %c0_11 = arith.constant 0 : index
    %c0_12 = arith.constant 0 : index
    %16 = vector.load %arg8[%c0_11, %c0_12] : memref<8x128xf32, #tpu.memory_space<vmem>>, vector<8x128xf32>
    tpu.vector_store %arg8[%c0_11, %c0_12], %15 {strides = array<i32>} : memref<8x128xf32, #tpu.memory_space<vmem>>, vector<8x128xf32>,
    %c1_i32 = arith.constant 1 : i32
    %17 = arith.cmpi eq, %arg1, %c1_i32 : i32
    %18 = arith.extui %17 : i1 to i32
    %c0_i32_13 = arith.constant 0 : i32
    %19 = arith.cmpi ne, %18, %c0_i32_13 : i32
    scf.if %19 {
      %c0_14 = arith.constant 0 : index
      %c0_15 = arith.constant 0 : index
      %20 = vector.load %arg8[%c0_14, %c0_15] : memref<8x128xf32, #tpu.memory_space<vmem>>, vector<8x128xf32>
      %21 = arith.truncf %20 : vector<8x128xf32> to vector<8x128xbf16>
      %c0_16 = arith.constant 0 : index
      %c0_17 = arith.constant 0 : index
      %22 = vector.load %arg5[%c0_16, %c0_17] : memref<128x128xbf16, #tpu.memory_space<vmem>>, vector<128x128xbf16>
      %cst_18 = arith.constant dense<0.000000e+00> : vector<8x128xf32>
      %23 = tpu.matmul %21, %22, %cst_18 {dimension_numbers = #tpu.dot_dimension_numbers<[1], [0], [0], [1], [0, 0, 1, 1], [], []>} : vector<8x128xbf16>, vector<128x128xbf16>, vector<8x128xf32> -> vector<8x128xf32>
      %c0_19 = arith.constant 0 : index
      %c0_20 = arith.constant 0 : index
      %24 = vector.load %arg6[%c0_19, %c0_20] : memref<1x128xf32, #tpu.memory_space<vmem>>, vector<1x128xf32>
      %25 = vector.broadcast %24 : vector<1x128xf32> to vector<8x128xf32>
      %26 = arith.addf %23, %25 : vector<8x128xf32>
      %c0_21 = arith.constant 0 : index
      %c0_22 = arith.constant 0 : index
      %27 = vector.load %arg7[%c0_21, %c0_22] : memref<8x128xf32, #tpu.memory_space<vmem>>, vector<8x128xf32>
      tpu.vector_store %arg7[%c0_21, %c0_22], %26 {strides = array<i32>} : memref<8x128xf32, #tpu.memory_space<vmem>>, vector<8x128xf32>,
    } else {
    }
    return
  }
  func.func @transform_0(%arg0: i32, %arg1: i32) -> (i32, i32, i32) {
    %c0_i32 = arith.constant 0 : i32
    %c0_i32_0 = arith.constant 0 : i32
    return %arg0, %arg1, %c0_i32 : i32, i32, i32
  }
  func.func @transform_1(%arg0: i32, %arg1: i32) -> (i32, i32) {
    %c0_i32 = arith.constant 0 : i32
    %c0_i32_0 = arith.constant 0 : i32
    %c0_i32_1 = arith.constant 0 : i32
    return %c0_i32, %c0_i32_0 : i32, i32
  }
  func.func @transform_2(%arg0: i32, %arg1: i32) -> (i32, i32) {
    %c0_i32 = arith.constant 0 : i32
    %c0_i32_0 = arith.constant 0 : i32
    %c0_i32_1 = arith.constant 0 : i32
    return %c0_i32, %c0_i32_0 : i32, i32
  }
  func.func @transform_3(%arg0: i32, %arg1: i32) -> (i32, i32) {
    %c0_i32 = arith.constant 0 : i32
    %c0_i32_0 = arith.constant 0 : i32
    %c0_i32_1 = arith.constant 0 : i32
    return %c0_i32, %c0_i32_0 : i32, i32
  }
  func.func @transform_4(%arg0: i32, %arg1: i32) -> (i32, i32) {
    %c0_i32 = arith.constant 0 : i32
    %c0_i32_0 = arith.constant 0 : i32
    %c0_i32_1 = arith.constant 0 : i32
    return %c0_i32, %c0_i32_0 : i32, i32
  }
  func.func @transform_5(%arg0: i32, %arg1: i32) -> (i32, i32) {
    %c0_i32 = arith.constant 0 : i32
    %c0_i32_0 = arith.constant 0 : i32
    return %arg0, %c0_i32 : i32, i32
  }
}

</mosaic_0001>

<bundles_post_ra>
// kernel: tpu_custom_call.1
= control target key start
LH: loop header
LB: loop body
LE: loop exit
PB: predicated region body
PF: predicated region fallthrough
CT: control target
= control target key end

     0   :  { %s3663_s0 = inlined_call_operand.vmem [shape: bf16[16,256,36], index: 0, kind: input, shape index: {}]   ;;  %s3664_s1 = inlined_call_operand.vmem [shape: bf16[36,128], index: 1, kind: input, shape index: {}]   ;;  %s3665_s2 = inlined_call_operand.vmem [shape: f32[1,128], index: 2, kind: input, shape index: {}]   ;;  %s3666_s3 = inlined_call_operand.vmem [shape: bf16[128,128], index: 3, kind: input, shape index: {}]   ;;  %s3667_s4 = inlined_call_operand.vmem [shape: f32[1,128], index: 4, kind: input, shape index: {}]   ;;  %s3668_s5 = inlined_call_operand.hbm [shape: f32[16,128], index: 5, kind: output, shape index: {}]  }
   0x1   :  { %3670 = sst [smem:[#allocation8_spill]] %s3663_s0 }
   0x2   :  { %3671 = sst [smem:[#allocation9_spill]] %s3664_s1 }
   0x3   :  { %10 = vsyncpa [#allocation5], 0 }
   0x4   :  { %12 = vsyncpa [#allocation5 + $0x1], 0  ;;  %s2999_s18 = smov 0   ;;  %s3001_s19 = smov 0  }
   0x5   :  { %s3003_s20 = smov 0   ;;  %s3005_s21 = smov 0  }
   0x6   :  { %s3007_s22 = smov 0   ;;  %s3009_s23 = smov 0  }
   0x7   :  { %s3011_s24 = smov 0   ;;  %s3013_s25 = smov 0  }
   0x8   :  { %s3015_s26 = smov 0   ;;  %s3017_s27 = smov 0  }
   0x9 LB: > { %s2303_s28 = sadd.s32 4294967295, %s2966_s27   ;;  %s2304_s29 = sadd.s32 4294967294, %s2966_s27   ;;  %s2966_s27 = sphi %s3017_s27, %s18_s27   ;;  %s2962_s26 = sphi %s3015_s26, %s3687_s26   ;;  %s2958_s25 = sphi %s3013_s25, %s3686_s25   ;;  %s2954_s24 = sphi %s3011_s24, %s3685_s24   ;;  %s2950_s23 = sphi %s3009_s23, %s3684_s23   ;;  %s2946_s22 = sphi %s3007_s22, %s3683_s22   ;;  %s2942_s21 = sphi %s3005_s21, %s3682_s21   ;;  %s2938_s20 = sphi %s3003_s20, %s3681_s20   ;;  %s2934_s19 = sphi %s3001_s19, %s3680_s19   ;;  %s2930_s18 = sphi %s2999_s18, %s3679_s18  }
   0xa   : > { %s27_s30 = sadd.s32 1, %s2958_s25  ;;  %s30_s6 = sadd.s32 1, %s2962_s26 }
   0xb   : > { %p28_p0 = scmp.ge.s32.totalorder %s27_s30, 2  ;;  %s39_s7 = sadd.s32 1, %s2946_s22 }
   0xc   : > { %p46_p1 = scmp.ne.s32.totalorder %s2946_s22, %s2942_s21  ;;  %p47_p2 = scmp.eq.s32.totalorder %s2966_s27, 0 }
   0xd   : > { %s3689_s30 = smov (%p28_p0, %s27_s30), 0  ;;  %s3691_s6 = smov (!%p28_p0, %s30_s6), %s2962_s26 }
   0xe   : > { %s35_s8 = ssub.s32 %s2958_s25, %s3689_s30  ;;  %p3062_p3 = por %p47_p2, %p46_p1 }
   0xf   : > { %p32_p4 = scmp.ge.s32.totalorder %s3691_s6, 2  ;;  %s149_s10 = sadd.s32 1, %s2938_s20 }
  0x10   : > { %p159_p5 = scmp.ne.s32.totalorder %s2938_s20, %s2934_s19  ;;  %p160_p6 = scmp.eq.s32.totalorder %s2303_s28, 3 }
  0x11   : > { %s3693_s6 = smov (%p32_p4, %s3691_s6), 0  ;;  %p165_p8 = scmp.ne.s32.totalorder %s2934_s19, %s2930_s18 }
  0x12   : > { %3673 = sst [smem:[#allocation7_spill]] %s3693_s6  ;;  %p3071_p7 = por %p160_p6, %p159_p5 }
  0x13   : > { %s34_s12 = ssub.s32 %s2962_s26, %s3693_s6  ;;  %p166_p9 = scmp.eq.s32.totalorder %s2304_s29, 3 }
  0x14   : > { %s36_s13 = sor.u32 %s35_s8, %s34_s12  ;;  %p147_p10 = scmp.eq.s32.totalorder %s34_s12, 0 }
  0x15   : > { %p37_p11 = scmp.eq.s32.totalorder %s36_s13, 0  ;;  %p3079_p12 = por %p166_p9, %p165_p8 }
  0x16   : > { %s3084_s15 = scalar_select %p147_p10, %s2938_s20, %s149_s10  }
  0x17   : > { %s3087_s16 = scalar_select %p37_p11, %s2946_s22, %s39_s7  }
  0x18   : > { %p2306_p13 = scmp.ge.s32.totalorder %s2966_s27, 4 }
  0x1a   : > { %194 = sbr.rel (%p2306_p13) target bundleno = 105 (0x69), region = 32 }
  0x1f   : > { %197 = sbr.rel (!%p3062_p3) target bundleno = 105 (0x69), region = 36  ;;  %s199_s17 = sand.u32 (%p3062_p3), 1, %s2946_s22  }
  0x20   : > { %s2309_s28 = sshll.u32 (%p3062_p3), %s2958_s25, 4  ;;  %s2307_s29 = sshll.u32 (%p3062_p3), %s199_s17, 9 }
  0x21   : > { %s2681_s8 = sshll.u32 (%p3062_p3), %s2962_s26, 8  ;;  %s3676_s0 = sld [smem:[#allocation8_spill]] (%p3062_p3) }
  0x22   : > { %s205_s12 = sadd.s32 (%p3062_p3), %s2681_s8, %s2309_s28  ;;  %s3103_s9 = scalar_lea.vmem (%p3062_p3), [#allocation3], %s2307_s29 }
  0x23   : > { %s2311_s13 = sshll.u32 (%p3062_p3), %s205_s12, 2 }
  0x27   : > { %s3098_s7 = scalar_lea.vmem %s3676_s0, %s2311_s13 }
  0x28   : > { %v224_v0 = vld [vmem:[%s3098_s7] sm:$0xff]   ;;  %v228_v1 = vld [vmem:[%s3098_s7 + $0x8] sm:$0xff]   ;;  %v232_v2 = vld [vmem:[%s3098_s7 + $0x10] sm:$0xff]  }
  0x29   : > { %225 = vst [vmem:[%s3103_s9] sm:$0xff] %v224_v0   ;;  %v236_v3 = vld [vmem:[%s3098_s7 + $0x18] sm:$0xff]   ;;  %v240_v4 = vld [vmem:[%s3098_s7 + $0x20] sm:$0xff]   ;;  %v244_v5 = vld [vmem:[%s3098_s7 + $0x28] sm:$0xff]  }
  0x2a   : > { %229 = vst [vmem:[%s3103_s9 + $0x8] sm:$0xff] %v228_v1   ;;  %v248_v6 = vld [vmem:[%s3098_s7 + $0x30] sm:$0xff]   ;;  %v252_v7 = vld [vmem:[%s3098_s7 + $0x38] sm:$0xff]   ;;  %v256_v8 = vld [vmem:[%s3098_s7 + $0x80] sm:$0xff]  }
  0x2b   : > { %233 = vst [vmem:[%s3103_s9 + $0x10] sm:$0xff] %v232_v2   ;;  %v260_v9 = vld [vmem:[%s3098_s7 + $0x88] sm:$0xff]   ;;  %v264_v10 = vld [vmem:[%s3098_s7 + $0x90] sm:$0xff]   ;;  %v268_v11 = vld [vmem:[%s3098_s7 + $0x98] sm:$0xff]  }
  0x2c   : > { %237 = vst [vmem:[%s3103_s9 + $0x18] sm:$0xff] %v236_v3   ;;  %v272_v12 = vld [vmem:[%s3098_s7 + $0xa0] sm:$0xff]   ;;  %v276_v13 = vld [vmem:[%s3098_s7 + $0xa8] sm:$0xff]   ;;  %v280_v14 = vld [vmem:[%s3098_s7 + $0xb0] sm:$0xff]  }
  0x2d   : > { %241 = vst [vmem:[%s3103_s9 + $0x20] sm:$0xff] %v240_v4   ;;  %v284_v15 = vld [vmem:[%s3098_s7 + $0xb8] sm:$0xff]   ;;  %v288_v16 = vld [vmem:[%s3098_s7 + $0x100] sm:$0xff]   ;;  %v292_v17 = vld [vmem:[%s3098_s7 + $0x108] sm:$0xff]  }
  0x2e   : > { %245 = vst [vmem:[%s3103_s9 + $0x28] sm:$0xff] %v244_v5   ;;  %v296_v18 = vld [vmem:[%s3098_s7 + $0x110] sm:$0xff]   ;;  %v300_v19 = vld [vmem:[%s3098_s7 + $0x118] sm:$0xff]   ;;  %v304_v20 = vld [vmem:[%s3098_s7 + $0x120] sm:$0xff]  }
  0x2f   : > { %249 = vst [vmem:[%s3103_s9 + $0x30] sm:$0xff] %v248_v6   ;;  %v308_v21 = vld [vmem:[%s3098_s7 + $0x128] sm:$0xff]   ;;  %v312_v22 = vld [vmem:[%s3098_s7 + $0x130] sm:$0xff]   ;;  %v316_v23 = vld [vmem:[%s3098_s7 + $0x138] sm:$0xff]  }
  0x30   : > { %253 = vst [vmem:[%s3103_s9 + $0x38] sm:$0xff] %v252_v7   ;;  %v320_v24 = vld [vmem:[%s3098_s7 + $0x180] sm:$0xff]   ;;  %v324_v25 = vld [vmem:[%s3098_s7 + $0x188] sm:$0xff]   ;;  %v328_v26 = vld [vmem:[%s3098_s7 + $0x190] sm:$0xff]  }
  0x31   : > { %257 = vst [vmem:[%s3103_s9 + $0x40] sm:$0xff] %v256_v8   ;;  %v332_v27 = vld [vmem:[%s3098_s7 + $0x198] sm:$0xff]   ;;  %v336_v28 = vld [vmem:[%s3098_s7 + $0x1a0] sm:$0xff]   ;;  %v340_v29 = vld [vmem:[%s3098_s7 + $0x1a8] sm:$0xff]  }
  0x32   : > { %261 = vst [vmem:[%s3103_s9 + $0x48] sm:$0xff] %v260_v9   ;;  %v344_v30 = vld [vmem:[%s3098_s7 + $0x1b0] sm:$0xff]   ;;  %v348_v31 = vld [vmem:[%s3098_s7 + $0x1b8] sm:$0xff]   ;;  %v352_v32 = vld [vmem:[%s3098_s7 + $0x200] sm:$0xff]  }
  0x33   : > { %265 = vst [vmem:[%s3103_s9 + $0x50] sm:$0xff] %v264_v10   ;;  %v356_v33 = vld [vmem:[%s3098_s7 + $0x208] sm:$0xff]   ;;  %v360_v34 = vld [vmem:[%s3098_s7 + $0x210] sm:$0xff]   ;;  %v364_v35 = vld [vmem:[%s3098_s7 + $0x218] sm:$0xff]  }
  0x34   : > { %269 = vst [vmem:[%s3103_s9 + $0x58] sm:$0xff] %v268_v11   ;;  %v368_v36 = vld [vmem:[%s3098_s7 + $0x220] sm:$0xff]   ;;  %v372_v37 = vld [vmem:[%s3098_s7 + $0x228] sm:$0xff]   ;;  %v376_v38 = vld [vmem:[%s3098_s7 + $0x230] sm:$0xff]  }
  0x35   : > { %273 = vst [vmem:[%s3103_s9 + $0x60] sm:$0xff] %v272_v12   ;;  %v380_v39 = vld [vmem:[%s3098_s7 + $0x238] sm:$0xff]   ;;  %v384_v40 = vld [vmem:[%s3098_s7 + $0x280] sm:$0xff]   ;;  %v388_v41 = vld [vmem:[%s3098_s7 + $0x288] sm:$0xff]  }
  0x36   : > { %277 = vst [vmem:[%s3103_s9 + $0x68] sm:$0xff] %v276_v13   ;;  %v392_v42 = vld [vmem:[%s3098_s7 + $0x290] sm:$0xff]   ;;  %v396_v43 = vld [vmem:[%s3098_s7 + $0x298] sm:$0xff]   ;;  %v400_v44 = vld [vmem:[%s3098_s7 + $0x2a0] sm:$0xff]  }
  0x37   : > { %281 = vst [vmem:[%s3103_s9 + $0x70] sm:$0xff] %v280_v14   ;;  %v404_v45 = vld [vmem:[%s3098_s7 + $0x2a8] sm:$0xff]   ;;  %v408_v46 = vld [vmem:[%s3098_s7 + $0x2b0] sm:$0xff]   ;;  %v412_v47 = vld [vmem:[%s3098_s7 + $0x2b8] sm:$0xff]  }
  0x38   : > { %285 = vst [vmem:[%s3103_s9 + $0x78] sm:$0xff] %v284_v15   ;;  %v416_v48 = vld [vmem:[%s3098_s7 + $0x300] sm:$0xff]   ;;  %v420_v49 = vld [vmem:[%s3098_s7 + $0x308] sm:$0xff]   ;;  %v424_v50 = vld [vmem:[%s3098_s7 + $0x310] sm:$0xff]  }
  0x39   : > { %289 = vst [vmem:[%s3103_s9 + $0x80] sm:$0xff] %v288_v16   ;;  %v428_v51 = vld [vmem:[%s3098_s7 + $0x318] sm:$0xff]   ;;  %v432_v52 = vld [vmem:[%s3098_s7 + $0x320] sm:$0xff]   ;;  %v436_v53 = vld [vmem:[%s3098_s7 + $0x328] sm:$0xff]  }
  0x3a   : > { %293 = vst [vmem:[%s3103_s9 + $0x88] sm:$0xff] %v292_v17   ;;  %v440_v54 = vld [vmem:[%s3098_s7 + $0x330] sm:$0xff]   ;;  %v444_v55 = vld [vmem:[%s3098_s7 + $0x338] sm:$0xff]   ;;  %v448_v56 = vld [vmem:[%s3098_s7 + $0x380] sm:$0xff]  }
  0x3b   : > { %297 = vst [vmem:[%s3103_s9 + $0x90] sm:$0xff] %v296_v18   ;;  %v452_v57 = vld [vmem:[%s3098_s7 + $0x388] sm:$0xff]   ;;  %v456_v58 = vld [vmem:[%s3098_s7 + $0x390] sm:$0xff]   ;;  %v460_v59 = vld [vmem:[%s3098_s7 + $0x398] sm:$0xff]  }
  0x3c   : > { %301 = vst [vmem:[%s3103_s9 + $0x98] sm:$0xff] %v300_v19   ;;  %v464_v60 = vld [vmem:[%s3098_s7 + $0x3a0] sm:$0xff]   ;;  %v468_v61 = vld [vmem:[%s3098_s7 + $0x3a8] sm:$0xff]   ;;  %v472_v62 = vld [vmem:[%s3098_s7 + $0x3b0] sm:$0xff]  }
  0x3d   : > { %305 = vst [vmem:[%s3103_s9 + $0xa0] sm:$0xff] %v304_v20   ;;  %v476_v63 = vld [vmem:[%s3098_s7 + $0x3b8] sm:$0xff]  }
  0x3e   : > { %309 = vst [vmem:[%s3103_s9 + $0xa8] sm:$0xff] %v308_v21  }
  0x3f   : > { %313 = vst [vmem:[%s3103_s9 + $0xb0] sm:$0xff] %v312_v22  }
  0x40   : > { %317 = vst [vmem:[%s3103_s9 + $0xb8] sm:$0xff] %v316_v23  }
  0x41   : > { %321 = vst [vmem:[%s3103_s9 + $0xc0] sm:$0xff] %v320_v24  }
  0x42   : > { %325 = vst [vmem:[%s3103_s9 + $0xc8] sm:$0xff] %v324_v25  }
  0x43   : > { %329 = vst [vmem:[%s3103_s9 + $0xd0] sm:$0xff] %v328_v26  }
  0x44   : > { %333 = vst [vmem:[%s3103_s9 + $0xd8] sm:$0xff] %v332_v27  }
  0x45   : > { %337 = vst [vmem:[%s3103_s9 + $0xe0] sm:$0xff] %v336_v28  }
  0x46   : > { %341 = vst [vmem:[%s3103_s9 + $0xe8] sm:$0xff] %v340_v29  }
  0x47   : > { %345 = vst [vmem:[%s3103_s9 + $0xf0] sm:$0xff] %v344_v30  }
  0x48   : > { %349 = vst [vmem:[%s3103_s9 + $0xf8] sm:$0xff] %v348_v31  }
  0x49   : > { %353 = vst [vmem:[%s3103_s9 + $0x100] sm:$0xff] %v352_v32  }
  0x4a   : > { %357 = vst [vmem:[%s3103_s9 + $0x108] sm:$0xff] %v356_v33  }
  0x4b   : > { %361 = vst [vmem:[%s3103_s9 + $0x110] sm:$0xff] %v360_v34  }
  0x4c   : > { %365 = vst [vmem:[%s3103_s9 + $0x118] sm:$0xff] %v364_v35  }
  0x4d   : > { %369 = vst [vmem:[%s3103_s9 + $0x120] sm:$0xff] %v368_v36  }
  0x4e   : > { %373 = vst [vmem:[%s3103_s9 + $0x128] sm:$0xff] %v372_v37  }
  0x4f   : > { %377 = vst [vmem:[%s3103_s9 + $0x130] sm:$0xff] %v376_v38  }
  0x50   : > { %381 = vst [vmem:[%s3103_s9 + $0x138] sm:$0xff] %v380_v39  }
  0x51   : > { %385 = vst [vmem:[%s3103_s9 + $0x140] sm:$0xff] %v384_v40  }
  0x52   : > { %389 = vst [vmem:[%s3103_s9 + $0x148] sm:$0xff] %v388_v41  }
  0x53   : > { %393 = vst [vmem:[%s3103_s9 + $0x150] sm:$0xff] %v392_v42  }
  0x54   : > { %397 = vst [vmem:[%s3103_s9 + $0x158] sm:$0xff] %v396_v43  }
  0x55   : > { %401 = vst [vmem:[%s3103_s9 + $0x160] sm:$0xff] %v400_v44  }
  0x56   : > { %405 = vst [vmem:[%s3103_s9 + $0x168] sm:$0xff] %v404_v45  }
  0x57   : > { %409 = vst [vmem:[%s3103_s9 + $0x170] sm:$0xff] %v408_v46  }
  0x58   : > { %413 = vst [vmem:[%s3103_s9 + $0x178] sm:$0xff] %v412_v47  }
  0x59   : > { %417 = vst [vmem:[%s3103_s9 + $0x180] sm:$0xff] %v416_v48  }
  0x5a   : > { %421 = vst [vmem:[%s3103_s9 + $0x188] sm:$0xff] %v420_v49  }
  0x5b   : > { %425 = vst [vmem:[%s3103_s9 + $0x190] sm:$0xff] %v424_v50  }
  0x5c   : > { %429 = vst [vmem:[%s3103_s9 + $0x198] sm:$0xff] %v428_v51  }
  0x5d   : > { %433 = vst [vmem:[%s3103_s9 + $0x1a0] sm:$0xff] %v432_v52  }
  0x5e   : > { %437 = vst [vmem:[%s3103_s9 + $0x1a8] sm:$0xff] %v436_v53  }
  0x5f   : > { %441 = vst [vmem:[%s3103_s9 + $0x1b0] sm:$0xff] %v440_v54  }
  0x60   : > { %445 = vst [vmem:[%s3103_s9 + $0x1b8] sm:$0xff] %v444_v55  }
  0x61   : > { %449 = vst [vmem:[%s3103_s9 + $0x1c0] sm:$0xff] %v448_v56  }
  0x62   : > { %453 = vst [vmem:[%s3103_s9 + $0x1c8] sm:$0xff] %v452_v57  }
  0x63   : > { %457 = vst [vmem:[%s3103_s9 + $0x1d0] sm:$0xff] %v456_v58  }
  0x64   : > { %461 = vst [vmem:[%s3103_s9 + $0x1d8] sm:$0xff] %v460_v59  }
  0x65   : > { %465 = vst [vmem:[%s3103_s9 + $0x1e0] sm:$0xff] %v464_v60  }
  0x66   : > { %469 = vst [vmem:[%s3103_s9 + $0x1e8] sm:$0xff] %v468_v61  }
  0x67   : > { %473 = vst [vmem:[%s3103_s9 + $0x1f0] sm:$0xff] %v472_v62  }
  0x68   : > { %477 = vst [vmem:[%s3103_s9 + $0x1f8] sm:$0xff] %v476_v63  }
  0x69 PF: > { %p2312_p0 = scmp.ge.s32.totalorder %s2966_s27, 1  ;;  %p758_p1 = scmp.lt.s32.totalorder %s2966_s27, 5 }
  0x6b   : > { %p759_p2 = pnand %p2312_p0, %p758_p1 }
  0x6c   : > { %s765_s6 = sand.u32 (!%p759_p2), 1, %s2942_s21   ;;  %s789_s17 = sand.u32 (!%p759_p2), 1, %s2934_s19  }
  0x6d   : > { %762 = sbr.rel (%p759_p2) target bundleno = 730 (0x2da), region = 77  ;;  %s2313_s28 = sshll.u32 (!%p759_p2), %s765_s6, 9 }
  0x6e   : > { %s3236_s29 = sshll.u32 (!%p759_p2), %s789_s17, 3  ;;  %s3238_s8 = scalar_lea.vmem (!%p759_p2), [#allocation3], %s2313_s28 }
  0x6f   : > { %s791_s12 = scalar_lea.vmem (!%p759_p2), [#allocation4], %s3236_s29  ;;  %p2315_p3 = scmp.ne.s32.totalorder (!%p759_p2), %s2950_s23, 0 }
  0x72   : > { %798 = sbr.rel (%p2315_p3) target bundleno = 121 (0x79), region = 85 }
  0x77   : > { %v2968_v0 = vmov 0.0  }
  0x78   : > { %799 = vst [vmem:[#allocation2] sm:$0xff] %v2968_v0 }
  0x79 PF: > { %s3677_s1 = sld [smem:[#allocation9_spill]]  ;;  %vm1465_vm0 = vcmask 1041408   ;;  %v2682_v7 = vld [vmem:[%s3238_s8] sm:$0xff]  ;;  %vm1272_vm1 = vcmask 293888   ;;  %v2683_v11 = vld [vmem:[%s3238_s8 + $0x8] sm:$0xff]  ;;  %v2684_v15 = vld [vmem:[%s3238_s8 + $0x10] sm:$0xff] }
  0x7a   : > { %v2698_v8 = vld [vmem:[%s3238_s8 + $0x80] sm:$0xff]  ;;  %v2699_v12 = vld [vmem:[%s3238_s8 + $0x88] sm:$0xff]  ;;  %v2700_v16 = vld [vmem:[%s3238_s8 + $0x90] sm:$0xff]  ;;  %vm2103_vm2 = vcmask 1041409   ;;  %vm2105_vm3 = vcmask 1042434   ;;  %vm2107_vm4 = vcmask 1043459  }
  0x7b   : > { %v2714_v9 = vld [vmem:[%s3238_s8 + $0x100] sm:$0xff]  ;;  %v2715_v13 = vld [vmem:[%s3238_s8 + $0x108] sm:$0xff]  ;;  %v2716_v17 = vld [vmem:[%s3238_s8 + $0x110] sm:$0xff]  ;;  %vm2109_vm5 = vcmask 1044484   ;;  %vm2111_vm6 = vcmask 1045509   ;;  %vm2113_vm7 = vcmask 1046534  }
  0x7c   : > { %v2730_v10 = vld [vmem:[%s3238_s8 + $0x180] sm:$0xff]  ;;  %v2731_v14 = vld [vmem:[%s3238_s8 + $0x188] sm:$0xff]  ;;  %v2732_v18 = vld [vmem:[%s3238_s8 + $0x190] sm:$0xff]  ;;  %vm2115_vm8 = vcmask 1047559   ;;  %p2644_p4 = scmp.ne.s32.totalorder %s2950_s23, 1 }
  0x7d   : > { %v2685_v19 = vld [vmem:[%s3238_s8 + $0x18] sm:$0xff]  ;;  %v2686_v23 = vld [vmem:[%s3238_s8 + $0x20] sm:$0xff]  ;;  %v2687_v27 = vld [vmem:[%s3238_s8 + $0x28] sm:$0xff] }
  0x7e   : > { %v2701_v20 = vld [vmem:[%s3238_s8 + $0x98] sm:$0xff]  ;;  %v2702_v24 = vld [vmem:[%s3238_s8 + $0xa0] sm:$0xff]  ;;  %v2703_v28 = vld [vmem:[%s3238_s8 + $0xa8] sm:$0xff] }
  0x7f   : > { %v932_v1 = vld [vmem:[%s3677_s1 + $0x10] sm:$0x3]  ;;  %v2747_v5 = vld [vmem:[%s3677_s1 + $0x8] sm:$0xff]  ;;  %v2746_v6 = vld [vmem:[%s3677_s1] sm:$0xff] }
  0x80   : > { %v1266_v2 = vunpack.c.l.b16 %v932_v1  ;;  %v2717_v21 = vld [vmem:[%s3238_s8 + $0x118] sm:$0xff]  ;;  %v2718_v25 = vld [vmem:[%s3238_s8 + $0x120] sm:$0xff]  ;;  %v2719_v29 = vld [vmem:[%s3238_s8 + $0x128] sm:$0xff] }
  0x81   : > { %v2733_v22 = vld [vmem:[%s3238_s8 + $0x198] sm:$0xff]  ;;  %v2734_v26 = vld [vmem:[%s3238_s8 + $0x1a0] sm:$0xff]  ;;  %v2735_v30 = vld [vmem:[%s3238_s8 + $0x1a8] sm:$0xff] }
  0x82   : > { %v1269_v3 = vpack.c.b16 %v1266_v2, %v1266_v2  ;;  %v2688_v31 = vld [vmem:[%s3238_s8 + $0x30] sm:$0xff]  ;;  %v2689_v35 = vld [vmem:[%s3238_s8 + $0x38] sm:$0xff]  ;;  %v2690_v39 = vld [vmem:[%s3238_s8 + $0x40] sm:$0xff] }
  0x83   : > { %v2704_v32 = vld [vmem:[%s3238_s8 + $0xb0] sm:$0xff]  ;;  %v2705_v36 = vld [vmem:[%s3238_s8 + $0xb8] sm:$0xff]  ;;  %v2706_v40 = vld [vmem:[%s3238_s8 + $0xc0] sm:$0xff] }
  0x84   : > { %v1467_v4 = vsel %vm1465_vm0, %v1269_v3, 0  ;;  %v2720_v33 = vld [vmem:[%s3238_s8 + $0x130] sm:$0xff]  ;;  %v2721_v37 = vld [vmem:[%s3238_s8 + $0x138] sm:$0xff]  ;;  %v2722_v43 = vld [vmem:[%s3238_s8 + $0x140] sm:$0xff] }
  0x85   : > { %1474 = vmatpush.bf16.msra.mxu0 %v1467_v4  ;;  %2756 = vmatpush.bf16.msra.mxu1 %v1467_v4  ;;  %v2736_v34 = vld [vmem:[%s3238_s8 + $0x1b0] sm:$0xff]  ;;  %v2737_v38 = vld [vmem:[%s3238_s8 + $0x1b8] sm:$0xff]  ;;  %v2738_v44 = vld [vmem:[%s3238_s8 + $0x1c0] sm:$0xff] }
  0x86   : > { %2757 = vmatpush.bf16.msra.mxu2 %v1467_v4  ;;  %2758 = vmatpush.bf16.msra.mxu3 %v1467_v4  ;;  %v3322_v45 = vld [vmem:[%s3665_s2] ss:$0 sm:$0xff]  ;;  %v2691_v0 = vld [vmem:[%s3238_s8 + $0x48] sm:$0xff] }
  0x87   : > { %v2707_v1 = vld [vmem:[%s3238_s8 + $0xc8] sm:$0xff] }
  0x89   : > { %1475 = vmatpush.bf16.msra.mxu0 %v2747_v5  ;;  %2759 = vmatpush.bf16.msra.mxu1 %v2747_v5 }
  0x8a   : > { %2760 = vmatpush.bf16.msra.mxu2 %v2747_v5  ;;  %2761 = vmatpush.bf16.msra.mxu3 %v2747_v5 }
  0x8d   : > { %1476 = vmatpush.bf16.msra.mxu0 %v2746_v6  ;;  %2762 = vmatpush.bf16.msra.mxu1 %v2746_v6 }
  0x8e   : > { %2763 = vmatpush.bf16.msra.mxu2 %v2746_v6  ;;  %2764 = vmatpush.bf16.msra.mxu3 %v2746_v6  ;;  %v2723_v6 = vld [vmem:[%s3238_s8 + $0x148] sm:$0xff] }
  0x90   : > { %2580 = vmatmul.msk.bf16.vlgmr.msra.gmra.mxu0 %vm1272_vm1, %v2682_v7  ;;  %2596 = vmatmul.msk.bf16.vlgmr.msra.gmra.mxu1 %vm1272_vm1, %v2698_v8  ;;  %v2739_v7 = vld [vmem:[%s3238_s8 + $0x1c8] sm:$0xff] }
  0x91   : > { %2612 = vmatmul.msk.bf16.vlgmr.msra.gmra.mxu2 %vm1272_vm1, %v2714_v9  ;;  %2628 = vmatmul.msk.bf16.vlgmr.msra.gmra.mxu3 %vm1272_vm1, %v2730_v10 }
  0xa0   : > { %2581 = vmatmul.msk.bf16.gmra.mxu0 %vm1272_vm1, %v2683_v11  ;;  %2597 = vmatmul.msk.bf16.gmra.mxu1 %vm1272_vm1, %v2699_v12 }
  0xa1   : > { %2613 = vmatmul.msk.bf16.gmra.mxu2 %vm1272_vm1, %v2715_v13  ;;  %2629 = vmatmul.msk.bf16.gmra.mxu3 %vm1272_vm1, %v2731_v14 }
  0xb0   : > { %2582 = vmatmul.msk.bf16.gmra.mxu0 %vm1272_vm1, %v2684_v15  ;;  %2598 = vmatmul.msk.bf16.gmra.mxu1 %vm1272_vm1, %v2700_v16 }
  0xb1   : > { %2614 = vmatmul.msk.bf16.gmra.mxu2 %vm1272_vm1, %v2716_v17  ;;  %2630 = vmatmul.msk.bf16.gmra.mxu3 %vm1272_vm1, %v2732_v18 }
  0xc0   : > { %2583 = vmatmul.msk.bf16.gmra.mxu0 %vm1272_vm1, %v2685_v19  ;;  %2599 = vmatmul.msk.bf16.gmra.mxu1 %vm1272_vm1, %v2701_v20 }
  0xc1   : > { %2615 = vmatmul.msk.bf16.gmra.mxu2 %vm1272_vm1, %v2717_v21  ;;  %2631 = vmatmul.msk.bf16.gmra.mxu3 %vm1272_vm1, %v2733_v22 }
  0xd0   : > { %2584 = vmatmul.msk.bf16.gmra.mxu0 %vm1272_vm1, %v2686_v23  ;;  %2600 = vmatmul.msk.bf16.gmra.mxu1 %vm1272_vm1, %v2702_v24 }
  0xd1   : > { %2616 = vmatmul.msk.bf16.gmra.mxu2 %vm1272_vm1, %v2718_v25  ;;  %2632 = vmatmul.msk.bf16.gmra.mxu3 %vm1272_vm1, %v2734_v26 }
  0xe0   : > { %2585 = vmatmul.msk.bf16.gmra.mxu0 %vm1272_vm1, %v2687_v27  ;;  %2601 = vmatmul.msk.bf16.gmra.mxu1 %vm1272_vm1, %v2703_v28 }
  0xe1   : > { %2617 = vmatmul.msk.bf16.gmra.mxu2 %vm1272_vm1, %v2719_v29  ;;  %2633 = vmatmul.msk.bf16.gmra.mxu3 %vm1272_vm1, %v2735_v30 }
  0xf0   : > { %2586 = vmatmul.msk.bf16.gmra.mxu0 %vm1272_vm1, %v2688_v31  ;;  %2602 = vmatmul.msk.bf16.gmra.mxu1 %vm1272_vm1, %v2704_v32 }
  0xf1   : > { %2618 = vmatmul.msk.bf16.gmra.mxu2 %vm1272_vm1, %v2720_v33  ;;  %2634 = vmatmul.msk.bf16.gmra.mxu3 %vm1272_vm1, %v2736_v34 }
 0x100   : > { %2587 = vmatmul.msk.bf16.gmra.mxu0 %vm1272_vm1, %v2689_v35  ;;  %2603 = vmatmul.msk.bf16.gmra.mxu1 %vm1272_vm1, %v2705_v36 }
 0x101   : > { %2619 = vmatmul.msk.bf16.gmra.mxu2 %vm1272_vm1, %v2721_v37  ;;  %2635 = vmatmul.msk.bf16.gmra.mxu3 %vm1272_vm1, %v2737_v38  ;;  %v2692_v38 = vld [vmem:[%s3238_s8 + $0x50] sm:$0xff] }
 0x10d   : > { %v1478_v41 = vpop.f32.mrf.mxu0  ;;  %v1558_v42 = vpop.f32.mrf.mxu1 }
 0x10e   : > { %v1479_v46 = vadd.f32 %v3322_v45, %v1478_v41  ;;  %v1559_v47 = vadd.f32 %v3322_v45, %v1558_v42 }
 0x110   : > { %2588 = vmatmul.msk.bf16.gmra.mxu0 %vm1272_vm1, %v2690_v39  ;;  %2604 = vmatmul.msk.bf16.gmra.mxu1 %vm1272_vm1, %v2706_v40  ;;  %v1798_v54 = vmax.f32 %v1479_v46, 0.0  ;;  %v1830_v55 = vmax.f32 %v1559_v47, 0.0  ;;  %v2708_v39 = vld [vmem:[%s3238_s8 + $0xd0] sm:$0xff] }
 0x111   : > { %2620 = vmatmul.msk.bf16.gmra.mxu2 %vm1272_vm1, %v2722_v43  ;;  %2636 = vmatmul.msk.bf16.gmra.mxu3 %vm1272_vm1, %v2738_v44  ;;  %v2724_v44 = vld [vmem:[%s3238_s8 + $0x150] sm:$0xff] }
 0x112   : > { %v2740_v46 = vld [vmem:[%s3238_s8 + $0x1d0] sm:$0xff] }
 0x114   : > { %v1638_v48 = vpop.f32.mrf.mxu2  ;;  %v1718_v49 = vpop.f32.mrf.mxu3 }
 0x115   : > { %v1480_v50 = vpop.f32.mrf.mxu0  ;;  %v1560_v51 = vpop.f32.mrf.mxu1  ;;  %v1639_v60 = vadd.f32 %v3322_v45, %v1638_v48  ;;  %v1719_v61 = vadd.f32 %v3322_v45, %v1718_v49 }
 0x116   : > { %v1481_v52 = vadd.f32 %v3322_v45, %v1480_v50  ;;  %v1561_v53 = vadd.f32 %v3322_v45, %v1560_v51 }
 0x117   : > { %v1862_v10 = vmax.f32 %v1639_v60, 0.0  ;;  %v1894_v11 = vmax.f32 %v1719_v61, 0.0 }
 0x118   : > { %v1799_v56 = vmax.f32 %v1481_v52, 0.0  ;;  %v1831_v57 = vmax.f32 %v1561_v53, 0.0 }
 0x11a   : > { %v1927_v58 = vadd.f32 %v1799_v56, %v1798_v54  ;;  %v1969_v59 = vadd.f32 %v1831_v57, %v1830_v55 }
 0x11c   : > { %v1640_v62 = vpop.f32.mrf.mxu2  ;;  %v1720_v63 = vpop.f32.mrf.mxu3 }
 0x11d   : > { %v1641_v2 = vadd.f32 %v3322_v45, %v1640_v62  ;;  %v1721_v3 = vadd.f32 %v3322_v45, %v1720_v63  ;;  %v1483_v4 = vpop.f32.mrf.mxu0  ;;  %v1563_v5 = vpop.f32.mrf.mxu1 }
 0x11e   : > { %v1484_v8 = vadd.f32 %v3322_v45, %v1483_v4  ;;  %v1564_v9 = vadd.f32 %v3322_v45, %v1563_v5 }
 0x11f   : > { %v1863_v12 = vmax.f32 %v1641_v2, 0.0  ;;  %v1895_v13 = vmax.f32 %v1721_v3, 0.0 }
 0x120   : > { %v1800_v14 = vmax.f32 %v1484_v8, 0.0  ;;  %v1832_v15 = vmax.f32 %v1564_v9, 0.0  ;;  %2589 = vmatmul.msk.bf16.gmra.mxu0 %vm1272_vm1, %v2691_v0  ;;  %2605 = vmatmul.msk.bf16.gmra.mxu1 %vm1272_vm1, %v2707_v1 }
 0x121   : > { %v2011_v16 = vadd.f32 %v1863_v12, %v1862_v10  ;;  %v2053_v17 = vadd.f32 %v1895_v13, %v1894_v11  ;;  %2621 = vmatmul.msk.bf16.gmra.mxu2 %vm1272_vm1, %v2723_v6  ;;  %2637 = vmatmul.msk.bf16.gmra.mxu3 %vm1272_vm1, %v2739_v7  ;;  %v2693_v11 = vld [vmem:[%s3238_s8 + $0x58] sm:$0xff] }
 0x122   : > { %v1928_v18 = vadd.f32 %v1927_v58, %v1800_v14  ;;  %v1970_v19 = vadd.f32 %v1969_v59, %v1832_v15  ;;  %v2709_v12 = vld [vmem:[%s3238_s8 + $0xd8] sm:$0xff] }
 0x124   : > { %v1643_v20 = vpop.f32.mrf.mxu2  ;;  %v1723_v21 = vpop.f32.mrf.mxu3 }
 0x125   : > { %v1644_v22 = vadd.f32 %v3322_v45, %v1643_v20  ;;  %v1724_v23 = vadd.f32 %v3322_v45, %v1723_v21  ;;  %v1485_v24 = vpop.f32.mrf.mxu0  ;;  %v1565_v25 = vpop.f32.mrf.mxu1 }
 0x126   : > { %v1486_v26 = vadd.f32 %v3322_v45, %v1485_v24  ;;  %v1566_v27 = vadd.f32 %v3322_v45, %v1565_v25 }
 0x127   : > { %v1864_v28 = vmax.f32 %v1644_v22, 0.0  ;;  %v1896_v29 = vmax.f32 %v1724_v23, 0.0 }
 0x128   : > { %v1801_v30 = vmax.f32 %v1486_v26, 0.0  ;;  %v1833_v31 = vmax.f32 %v1566_v27, 0.0 }
 0x129   : > { %v2012_v32 = vadd.f32 %v2011_v16, %v1864_v28  ;;  %v2054_v33 = vadd.f32 %v2053_v17, %v1896_v29  ;;  %v2725_v17 = vld [vmem:[%s3238_s8 + $0x158] sm:$0xff] }
 0x12a   : > { %v1929_v34 = vadd.f32 %v1928_v18, %v1801_v30  ;;  %v1971_v35 = vadd.f32 %v1970_v19, %v1833_v31  ;;  %v2741_v18 = vld [vmem:[%s3238_s8 + $0x1d8] sm:$0xff] }
 0x12c   : > { %v1645_v36 = vpop.f32.mrf.mxu2  ;;  %v1725_v37 = vpop.f32.mrf.mxu3 }
 0x12d   : > { %v1646_v40 = vadd.f32 %v3322_v45, %v1645_v36  ;;  %v1726_v41 = vadd.f32 %v3322_v45, %v1725_v37  ;;  %v1488_v42 = vpop.f32.mrf.mxu0  ;;  %v1568_v43 = vpop.f32.mrf.mxu1 }
 0x12e   : > { %v1489_v47 = vadd.f32 %v3322_v45, %v1488_v42  ;;  %v1569_v48 = vadd.f32 %v3322_v45, %v1568_v43 }
 0x12f   : > { %v1865_v49 = vmax.f32 %v1646_v40, 0.0  ;;  %v1897_v50 = vmax.f32 %v1726_v41, 0.0 }
 0x130   : > { %v1802_v51 = vmax.f32 %v1489_v47, 0.0  ;;  %v1834_v52 = vmax.f32 %v1569_v48, 0.0  ;;  %2590 = vmatmul.msk.bf16.gmra.mxu0 %vm1272_vm1, %v2692_v38  ;;  %2606 = vmatmul.msk.bf16.gmra.mxu1 %vm1272_vm1, %v2708_v39  ;;  %v2694_v48 = vld [vmem:[%s3238_s8 + $0x60] sm:$0xff] }
 0x131   : > { %v2013_v53 = vadd.f32 %v2012_v32, %v1865_v49  ;;  %v2055_v54 = vadd.f32 %v2054_v33, %v1897_v50  ;;  %2622 = vmatmul.msk.bf16.gmra.mxu2 %vm1272_vm1, %v2724_v44  ;;  %2638 = vmatmul.msk.bf16.gmra.mxu3 %vm1272_vm1, %v2740_v46  ;;  %v2710_v49 = vld [vmem:[%s3238_s8 + $0xe0] sm:$0xff] }
 0x132   : > { %v1930_v55 = vadd.f32 %v1929_v34, %v1802_v51  ;;  %v1972_v56 = vadd.f32 %v1971_v35, %v1834_v52 }
 0x134   : > { %v1648_v57 = vpop.f32.mrf.mxu2  ;;  %v1728_v58 = vpop.f32.mrf.mxu3 }
 0x135   : > { %v1649_v59 = vadd.f32 %v3322_v45, %v1648_v57  ;;  %v1729_v60 = vadd.f32 %v3322_v45, %v1728_v58  ;;  %v1490_v61 = vpop.f32.mrf.mxu0  ;;  %v1570_v62 = vpop.f32.mrf.mxu1 }
 0x136   : > { %v1491_v63 = vadd.f32 %v3322_v45, %v1490_v61  ;;  %v1571_v0 = vadd.f32 %v3322_v45, %v1570_v62 }
 0x137   : > { %v1866_v1 = vmax.f32 %v1649_v59, 0.0  ;;  %v1898_v2 = vmax.f32 %v1729_v60, 0.0 }
 0x138   : > { %v1803_v3 = vmax.f32 %v1491_v63, 0.0  ;;  %v1835_v4 = vmax.f32 %v1571_v0, 0.0 }
 0x139   : > { %v2014_v5 = vadd.f32 %v2013_v53, %v1866_v1  ;;  %v2056_v6 = vadd.f32 %v2055_v54, %v1898_v2  ;;  %v2726_v54 = vld [vmem:[%s3238_s8 + $0x160] sm:$0xff] }
 0x13a   : > { %v1931_v7 = vadd.f32 %v1930_v55, %v1803_v3  ;;  %v1973_v8 = vadd.f32 %v1972_v56, %v1835_v4  ;;  %v2742_v55 = vld [vmem:[%s3238_s8 + $0x1e0] sm:$0xff] }
 0x13c   : > { %v1650_v9 = vpop.f32.mrf.mxu2  ;;  %v1730_v10 = vpop.f32.mrf.mxu3 }
 0x13d   : > { %v1651_v13 = vadd.f32 %v3322_v45, %v1650_v9  ;;  %v1731_v14 = vadd.f32 %v3322_v45, %v1730_v10  ;;  %v1493_v15 = vpop.f32.mrf.mxu0  ;;  %v1573_v16 = vpop.f32.mrf.mxu1 }
 0x13e   : > { %v1494_v19 = vadd.f32 %v3322_v45, %v1493_v15  ;;  %v1574_v20 = vadd.f32 %v3322_v45, %v1573_v16 }
 0x13f   : > { %v1867_v21 = vmax.f32 %v1651_v13, 0.0  ;;  %v1899_v22 = vmax.f32 %v1731_v14, 0.0 }
 0x140   : > { %v1804_v23 = vmax.f32 %v1494_v19, 0.0  ;;  %v1836_v24 = vmax.f32 %v1574_v20, 0.0  ;;  %2591 = vmatmul.msk.bf16.gmra.mxu0 %vm1272_vm1, %v2693_v11  ;;  %2607 = vmatmul.msk.bf16.gmra.mxu1 %vm1272_vm1, %v2709_v12  ;;  %v2695_v20 = vld [vmem:[%s3238_s8 + $0x68] sm:$0xff] }
 0x141   : > { %v2015_v25 = vadd.f32 %v2014_v5, %v1867_v21  ;;  %v2057_v26 = vadd.f32 %v2056_v6, %v1899_v22  ;;  %2623 = vmatmul.msk.bf16.gmra.mxu2 %vm1272_vm1, %v2725_v17  ;;  %2639 = vmatmul.msk.bf16.gmra.mxu3 %vm1272_vm1, %v2741_v18  ;;  %v2711_v21 = vld [vmem:[%s3238_s8 + $0xe8] sm:$0xff] }
 0x142   : > { %v1932_v27 = vadd.f32 %v1931_v7, %v1804_v23  ;;  %v1974_v28 = vadd.f32 %v1973_v8, %v1836_v24 }
 0x144   : > { %v1653_v29 = vpop.f32.mrf.mxu2  ;;  %v1733_v30 = vpop.f32.mrf.mxu3 }
 0x145   : > { %v1654_v31 = vadd.f32 %v3322_v45, %v1653_v29  ;;  %v1734_v32 = vadd.f32 %v3322_v45, %v1733_v30  ;;  %v1495_v33 = vpop.f32.mrf.mxu0  ;;  %v1575_v34 = vpop.f32.mrf.mxu1 }
 0x146   : > { %v1496_v35 = vadd.f32 %v3322_v45, %v1495_v33  ;;  %v1576_v36 = vadd.f32 %v3322_v45, %v1575_v34 }
 0x147   : > { %v1868_v37 = vmax.f32 %v1654_v31, 0.0  ;;  %v1900_v38 = vmax.f32 %v1734_v32, 0.0 }
 0x148   : > { %v1805_v39 = vmax.f32 %v1496_v35, 0.0  ;;  %v1837_v40 = vmax.f32 %v1576_v36, 0.0 }
 0x149   : > { %v2016_v41 = vadd.f32 %v2015_v25, %v1868_v37  ;;  %v2058_v42 = vadd.f32 %v2057_v26, %v1900_v38  ;;  %v2727_v26 = vld [vmem:[%s3238_s8 + $0x168] sm:$0xff] }
 0x14a   : > { %v1933_v43 = vadd.f32 %v1932_v27, %v1805_v39  ;;  %v1975_v44 = vadd.f32 %v1974_v28, %v1837_v40  ;;  %v2743_v27 = vld [vmem:[%s3238_s8 + $0x1e8] sm:$0xff] }
 0x14c   : > { %v1655_v46 = vpop.f32.mrf.mxu2  ;;  %v1735_v47 = vpop.f32.mrf.mxu3 }
 0x14d   : > { %v1656_v50 = vadd.f32 %v3322_v45, %v1655_v46  ;;  %v1736_v51 = vadd.f32 %v3322_v45, %v1735_v47  ;;  %v1498_v52 = vpop.f32.mrf.mxu0  ;;  %v1578_v53 = vpop.f32.mrf.mxu1 }
 0x14e   : > { %v1499_v56 = vadd.f32 %v3322_v45, %v1498_v52  ;;  %v1579_v57 = vadd.f32 %v3322_v45, %v1578_v53 }
 0x14f   : > { %v1869_v58 = vmax.f32 %v1656_v50, 0.0  ;;  %v1901_v59 = vmax.f32 %v1736_v51, 0.0 }
 0x150   : > { %v1806_v60 = vmax.f32 %v1499_v56, 0.0  ;;  %v1838_v61 = vmax.f32 %v1579_v57, 0.0  ;;  %2592 = vmatmul.msk.bf16.gmra.mxu0 %vm1272_vm1, %v2694_v48  ;;  %2608 = vmatmul.msk.bf16.gmra.mxu1 %vm1272_vm1, %v2710_v49  ;;  %v2696_v57 = vld [vmem:[%s3238_s8 + $0x70] sm:$0xff] }
 0x151   : > { %v2017_v62 = vadd.f32 %v2016_v41, %v1869_v58  ;;  %v2059_v63 = vadd.f32 %v2058_v42, %v1901_v59  ;;  %2624 = vmatmul.msk.bf16.gmra.mxu2 %vm1272_vm1, %v2726_v54  ;;  %2640 = vmatmul.msk.bf16.gmra.mxu3 %vm1272_vm1, %v2742_v55  ;;  %v2712_v58 = vld [vmem:[%s3238_s8 + $0xf0] sm:$0xff] }
 0x152   : > { %v1934_v0 = vadd.f32 %v1933_v43, %v1806_v60  ;;  %v1976_v1 = vadd.f32 %v1975_v44, %v1838_v61 }
 0x154   : > { %v1658_v2 = vpop.f32.mrf.mxu2  ;;  %v1738_v3 = vpop.f32.mrf.mxu3 }
 0x155   : > { %v1659_v4 = vadd.f32 %v3322_v45, %v1658_v2  ;;  %v1739_v5 = vadd.f32 %v3322_v45, %v1738_v3  ;;  %v1500_v6 = vpop.f32.mrf.mxu0  ;;  %v1580_v7 = vpop.f32.mrf.mxu1 }
 0x156   : > { %v1501_v8 = vadd.f32 %v3322_v45, %v1500_v6  ;;  %v1581_v9 = vadd.f32 %v3322_v45, %v1580_v7 }
 0x157   : > { %v1870_v10 = vmax.f32 %v1659_v4, 0.0  ;;  %v1902_v11 = vmax.f32 %v1739_v5, 0.0 }
 0x158   : > { %v1807_v12 = vmax.f32 %v1501_v8, 0.0  ;;  %v1839_v13 = vmax.f32 %v1581_v9, 0.0 }
 0x159   : > { %v2018_v14 = vadd.f32 %v2017_v62, %v1870_v10  ;;  %v2060_v15 = vadd.f32 %v2059_v63, %v1902_v11  ;;  %v2728_v63 = vld [vmem:[%s3238_s8 + $0x170] sm:$0xff] }
 0x15a   : > { %v1935_v16 = vadd.f32 %v1934_v0, %v1807_v12  ;;  %v1977_v17 = vadd.f32 %v1976_v1, %v1839_v13  ;;  %v2744_v0 = vld [vmem:[%s3238_s8 + $0x1f0] sm:$0xff] }
 0x15c   : > { %v1660_v18 = vpop.f32.mrf.mxu2  ;;  %v1740_v19 = vpop.f32.mrf.mxu3 }
 0x15d   : > { %v1661_v22 = vadd.f32 %v3322_v45, %v1660_v18  ;;  %v1741_v23 = vadd.f32 %v3322_v45, %v1740_v19  ;;  %v1503_v24 = vpop.f32.mrf.mxu0  ;;  %v1583_v25 = vpop.f32.mrf.mxu1 }
 0x15e   : > { %v1504_v28 = vadd.f32 %v3322_v45, %v1503_v24  ;;  %v1584_v29 = vadd.f32 %v3322_v45, %v1583_v25 }
 0x15f   : > { %v1871_v30 = vmax.f32 %v1661_v22, 0.0  ;;  %v1903_v31 = vmax.f32 %v1741_v23, 0.0 }
 0x160   : > { %v1808_v32 = vmax.f32 %v1504_v28, 0.0  ;;  %v1840_v33 = vmax.f32 %v1584_v29, 0.0  ;;  %2593 = vmatmul.msk.bf16.gmra.mxu0 %vm1272_vm1, %v2695_v20  ;;  %2609 = vmatmul.msk.bf16.gmra.mxu1 %vm1272_vm1, %v2711_v21  ;;  %v2697_v29 = vld [vmem:[%s3238_s8 + $0x78] sm:$0xff] }
 0x161   : > { %v2019_v34 = vadd.f32 %v2018_v14, %v1871_v30  ;;  %v2061_v35 = vadd.f32 %v2060_v15, %v1903_v31  ;;  %2625 = vmatmul.msk.bf16.gmra.mxu2 %vm1272_vm1, %v2727_v26  ;;  %2641 = vmatmul.msk.bf16.gmra.mxu3 %vm1272_vm1, %v2743_v27  ;;  %v2713_v30 = vld [vmem:[%s3238_s8 + $0xf8] sm:$0xff] }
 0x162   : > { %v1936_v36 = vadd.f32 %v1935_v16, %v1808_v32  ;;  %v1978_v37 = vadd.f32 %v1977_v17, %v1840_v33 }
 0x164   : > { %v1663_v38 = vpop.f32.mrf.mxu2  ;;  %v1743_v39 = vpop.f32.mrf.mxu3 }
 0x165   : > { %v1664_v40 = vadd.f32 %v3322_v45, %v1663_v38  ;;  %v1744_v41 = vadd.f32 %v3322_v45, %v1743_v39  ;;  %v1505_v42 = vpop.f32.mrf.mxu0  ;;  %v1585_v43 = vpop.f32.mrf.mxu1 }
 0x166   : > { %v1506_v44 = vadd.f32 %v3322_v45, %v1505_v42  ;;  %v1586_v46 = vadd.f32 %v3322_v45, %v1585_v43 }
 0x167   : > { %v1872_v47 = vmax.f32 %v1664_v40, 0.0  ;;  %v1904_v48 = vmax.f32 %v1744_v41, 0.0 }
 0x168   : > { %v1809_v49 = vmax.f32 %v1506_v44, 0.0  ;;  %v1841_v50 = vmax.f32 %v1586_v46, 0.0 }
 0x169   : > { %v2020_v51 = vadd.f32 %v2019_v34, %v1872_v47  ;;  %v2062_v52 = vadd.f32 %v2061_v35, %v1904_v48  ;;  %v2729_v35 = vld [vmem:[%s3238_s8 + $0x178] sm:$0xff] }
 0x16a   : > { %v1937_v53 = vadd.f32 %v1936_v36, %v1809_v49  ;;  %v1979_v54 = vadd.f32 %v1978_v37, %v1841_v50  ;;  %v2745_v36 = vld [vmem:[%s3238_s8 + $0x1f8] sm:$0xff] }
 0x16c   : > { %v1665_v55 = vpop.f32.mrf.mxu2  ;;  %v1745_v56 = vpop.f32.mrf.mxu3 }
 0x16d   : > { %v1666_v59 = vadd.f32 %v3322_v45, %v1665_v55  ;;  %v1746_v60 = vadd.f32 %v3322_v45, %v1745_v56  ;;  %v1508_v61 = vpop.f32.mrf.mxu0  ;;  %v1588_v62 = vpop.f32.mrf.mxu1 }
 0x16e   : > { %v1509_v1 = vadd.f32 %v3322_v45, %v1508_v61  ;;  %v1589_v2 = vadd.f32 %v3322_v45, %v1588_v62 }
 0x16f   : > { %v1873_v3 = vmax.f32 %v1666_v59, 0.0  ;;  %v1905_v4 = vmax.f32 %v1746_v60, 0.0 }
 0x170   : > { %v1810_v5 = vmax.f32 %v1509_v1, 0.0  ;;  %v1842_v6 = vmax.f32 %v1589_v2, 0.0  ;;  %2594 = vmatmul.msk.bf16.gmra.mxu0 %vm1272_vm1, %v2696_v57  ;;  %2610 = vmatmul.msk.bf16.gmra.mxu1 %vm1272_vm1, %v2712_v58 }
 0x171   : > { %v2021_v7 = vadd.f32 %v2020_v51, %v1873_v3  ;;  %v2063_v8 = vadd.f32 %v2062_v52, %v1905_v4  ;;  %2626 = vmatmul.msk.bf16.gmra.mxu2 %vm1272_vm1, %v2728_v63  ;;  %2642 = vmatmul.msk.bf16.gmra.mxu3 %vm1272_vm1, %v2744_v0 }
 0x172   : > { %v1938_v9 = vadd.f32 %v1937_v53, %v1810_v5  ;;  %v1980_v10 = vadd.f32 %v1979_v54, %v1842_v6 }
 0x174   : > { %v1668_v11 = vpop.f32.mrf.mxu2  ;;  %v1748_v12 = vpop.f32.mrf.mxu3 }
 0x175   : > { %v1669_v13 = vadd.f32 %v3322_v45, %v1668_v11  ;;  %v1749_v14 = vadd.f32 %v3322_v45, %v1748_v12  ;;  %v1510_v15 = vpop.f32.mrf.mxu0  ;;  %v1590_v16 = vpop.f32.mrf.mxu1 }
 0x176   : > { %v1511_v17 = vadd.f32 %v3322_v45, %v1510_v15  ;;  %v1591_v18 = vadd.f32 %v3322_v45, %v1590_v16 }
 0x177   : > { %v1874_v19 = vmax.f32 %v1669_v13, 0.0  ;;  %v1906_v20 = vmax.f32 %v1749_v14, 0.0 }
 0x178   : > { %v1811_v21 = vmax.f32 %v1511_v17, 0.0  ;;  %v1843_v22 = vmax.f32 %v1591_v18, 0.0 }
 0x179   : > { %v2022_v23 = vadd.f32 %v2021_v7, %v1874_v19  ;;  %v2064_v24 = vadd.f32 %v2063_v8, %v1906_v20 }
 0x17a   : > { %v1939_v25 = vadd.f32 %v1938_v9, %v1811_v21  ;;  %v1981_v26 = vadd.f32 %v1980_v10, %v1843_v22 }
 0x17c   : > { %v1670_v27 = vpop.f32.mrf.mxu2  ;;  %v1750_v28 = vpop.f32.mrf.mxu3 }
 0x17d   : > { %v1671_v31 = vadd.f32 %v3322_v45, %v1670_v27  ;;  %v1751_v32 = vadd.f32 %v3322_v45, %v1750_v28  ;;  %v1513_v33 = vpop.f32.mrf.mxu0  ;;  %v1593_v34 = vpop.f32.mrf.mxu1 }
 0x17e   : > { %v1514_v37 = vadd.f32 %v3322_v45, %v1513_v33  ;;  %v1594_v38 = vadd.f32 %v3322_v45, %v1593_v34 }
 0x17f   : > { %v1875_v39 = vmax.f32 %v1671_v31, 0.0  ;;  %v1907_v40 = vmax.f32 %v1751_v32, 0.0 }
 0x180   : > { %v1812_v41 = vmax.f32 %v1514_v37, 0.0  ;;  %v1844_v42 = vmax.f32 %v1594_v38, 0.0  ;;  %2595 = vmatmul.msk.bf16.gmra.mxu0 %vm1272_vm1, %v2697_v29  ;;  %2611 = vmatmul.msk.bf16.gmra.mxu1 %vm1272_vm1, %v2713_v30 }
 0x181   : > { %v2023_v43 = vadd.f32 %v2022_v23, %v1875_v39  ;;  %v2065_v44 = vadd.f32 %v2064_v24, %v1907_v40  ;;  %2627 = vmatmul.msk.bf16.gmra.mxu2 %vm1272_vm1, %v2729_v35  ;;  %2643 = vmatmul.msk.bf16.gmra.mxu3 %vm1272_vm1, %v2745_v36 }
 0x182   : > { %v1940_v46 = vadd.f32 %v1939_v25, %v1812_v41  ;;  %v1982_v47 = vadd.f32 %v1981_v26, %v1844_v42 }
 0x184   : > { %v1673_v48 = vpop.f32.mrf.mxu2  ;;  %v1753_v49 = vpop.f32.mrf.mxu3 }
 0x185   : > { %v1674_v50 = vadd.f32 %v3322_v45, %v1673_v48  ;;  %v1754_v51 = vadd.f32 %v3322_v45, %v1753_v49  ;;  %v1515_v52 = vpop.f32.mrf.mxu0  ;;  %v1595_v53 = vpop.f32.mrf.mxu1 }
 0x186   : > { %v1516_v54 = vadd.f32 %v3322_v45, %v1515_v52  ;;  %v1596_v55 = vadd.f32 %v3322_v45, %v1595_v53 }
 0x187   : > { %v1876_v56 = vmax.f32 %v1674_v50, 0.0  ;;  %v1908_v57 = vmax.f32 %v1754_v51, 0.0 }
 0x188   : > { %v1813_v58 = vmax.f32 %v1516_v54, 0.0  ;;  %v1845_v59 = vmax.f32 %v1596_v55, 0.0 }
 0x189   : > { %v2024_v60 = vadd.f32 %v2023_v43, %v1876_v56  ;;  %v2066_v61 = vadd.f32 %v2065_v44, %v1908_v57 }
 0x18a   : > { %v3446_v62 = vadd.f32 %v1940_v46, %v1813_v58  ;;  %v3448_v63 = vadd.f32 %v1982_v47, %v1845_v59 }
 0x18c   : > { %v1675_v0 = vpop.f32.mrf.mxu2  ;;  %v1755_v1 = vpop.f32.mrf.mxu3 }
 0x18d   : > { %v1676_v2 = vadd.f32 %v3322_v45, %v1675_v0  ;;  %v1756_v3 = vadd.f32 %v3322_v45, %v1755_v1  ;;  %v1518_v4 = vpop.f32.mrf.mxu0  ;;  %v1598_v5 = vpop.f32.mrf.mxu1 }
 0x18e   : > { %v1519_v10 = vadd.f32 %v3322_v45, %v1518_v4  ;;  %v1599_v11 = vadd.f32 %v3322_v45, %v1598_v5 }
 0x18f   : > { %v1877_v6 = vmax.f32 %v1676_v2, 0.0  ;;  %v1909_v7 = vmax.f32 %v1756_v3, 0.0 }
 0x190   : > { %v1814_v18 = vmax.f32 %v1519_v10, 0.0  ;;  %v1846_v19 = vmax.f32 %v1599_v11, 0.0 }
 0x191   : > { %v3452_v8 = vadd.f32 %v2024_v60, %v1877_v6  ;;  %v3454_v9 = vadd.f32 %v2066_v61, %v1909_v7 }
 0x194   : > { %v1678_v12 = vpop.f32.mrf.mxu2  ;;  %v1758_v13 = vpop.f32.mrf.mxu3 }
 0x195   : > { %v1520_v14 = vpop.f32.mrf.mxu0  ;;  %v1600_v15 = vpop.f32.mrf.mxu1  ;;  %v1679_v24 = vadd.f32 %v3322_v45, %v1678_v12  ;;  %v1759_v25 = vadd.f32 %v3322_v45, %v1758_v13 }
 0x196   : > { %v1521_v16 = vadd.f32 %v3322_v45, %v1520_v14  ;;  %v1601_v17 = vadd.f32 %v3322_v45, %v1600_v15 }
 0x197   : > { %v1878_v34 = vmax.f32 %v1679_v24, 0.0  ;;  %v1910_v35 = vmax.f32 %v1759_v25, 0.0 }
 0x198   : > { %v1815_v20 = vmax.f32 %v1521_v16, 0.0  ;;  %v1847_v21 = vmax.f32 %v1601_v17, 0.0 }
 0x19a   : > { %v1948_v22 = vadd.f32 %v1815_v20, %v1814_v18  ;;  %v1990_v23 = vadd.f32 %v1847_v21, %v1846_v19 }
 0x19c   : > { %v1680_v26 = vpop.f32.mrf.mxu2  ;;  %v1760_v27 = vpop.f32.mrf.mxu3 }
 0x19d   : > { %v1681_v28 = vadd.f32 %v3322_v45, %v1680_v26  ;;  %v1761_v29 = vadd.f32 %v3322_v45, %v1760_v27  ;;  %v1523_v30 = vpop.f32.mrf.mxu0  ;;  %v1603_v31 = vpop.f32.mrf.mxu1 }
 0x19e   : > { %v1524_v32 = vadd.f32 %v3322_v45, %v1523_v30  ;;  %v1604_v33 = vadd.f32 %v3322_v45, %v1603_v31 }
 0x19f   : > { %v1879_v36 = vmax.f32 %v1681_v28, 0.0  ;;  %v1911_v37 = vmax.f32 %v1761_v29, 0.0 }
 0x1a0   : > { %v1816_v38 = vmax.f32 %v1524_v32, 0.0  ;;  %v1848_v39 = vmax.f32 %v1604_v33, 0.0 }
 0x1a1   : > { %v2032_v40 = vadd.f32 %v1879_v36, %v1878_v34  ;;  %v2074_v41 = vadd.f32 %v1911_v37, %v1910_v35 }
 0x1a2   : > { %v1949_v42 = vadd.f32 %v1948_v22, %v1816_v38  ;;  %v1991_v43 = vadd.f32 %v1990_v23, %v1848_v39 }
 0x1a4   : > { %v1683_v44 = vpop.f32.mrf.mxu2  ;;  %v1763_v46 = vpop.f32.mrf.mxu3 }
 0x1a5   : > { %v1684_v47 = vadd.f32 %v3322_v45, %v1683_v44  ;;  %v1764_v48 = vadd.f32 %v3322_v45, %v1763_v46  ;;  %v1525_v49 = vpop.f32.mrf.mxu0  ;;  %v1605_v50 = vpop.f32.mrf.mxu1 }
 0x1a6   : > { %v1526_v51 = vadd.f32 %v3322_v45, %v1525_v49  ;;  %v1606_v52 = vadd.f32 %v3322_v45, %v1605_v50 }
 0x1a7   : > { %v1880_v53 = vmax.f32 %v1684_v47, 0.0  ;;  %v1912_v54 = vmax.f32 %v1764_v48, 0.0 }
 0x1a8   : > { %v1817_v55 = vmax.f32 %v1526_v51, 0.0  ;;  %v1849_v56 = vmax.f32 %v1606_v52, 0.0  ;;  %v1942_v52 = vrot.slane %v3446_v62, 4 }
 0x1a9   : > { %v2033_v57 = vadd.f32 %v2032_v40, %v1880_v53  ;;  %v2075_v58 = vadd.f32 %v2074_v41, %v1912_v54 }
 0x1aa   : > { %v1950_v59 = vadd.f32 %v1949_v42, %v1817_v55  ;;  %v1992_v60 = vadd.f32 %v1991_v43, %v1849_v56  ;;  %v1984_v55 = vrot.slane %v3448_v63, 4 }
 0x1ac   : > { %v1685_v61 = vpop.f32.mrf.mxu2  ;;  %v1765_v0 = vpop.f32.mrf.mxu3 }
 0x1ad   : > { %v1686_v1 = vadd.f32 %v3322_v45, %v1685_v61  ;;  %v1766_v2 = vadd.f32 %v3322_v45, %v1765_v0  ;;  %v1528_v3 = vpop.f32.mrf.mxu0  ;;  %v1608_v4 = vpop.f32.mrf.mxu1 }
 0x1ae   : > { %v1529_v5 = vadd.f32 %v3322_v45, %v1528_v3  ;;  %v1609_v6 = vadd.f32 %v3322_v45, %v1608_v4 }
 0x1af   : > { %v1881_v7 = vmax.f32 %v1686_v1, 0.0  ;;  %v1913_v10 = vmax.f32 %v1766_v2, 0.0 }
 0x1b0   : > { %v1818_v11 = vmax.f32 %v1529_v5, 0.0  ;;  %v1850_v12 = vmax.f32 %v1609_v6, 0.0  ;;  %v3517_v6 = vadd.f32 %v1984_v55, %v3448_v63 }
 0x1b1   : > { %v2034_v13 = vadd.f32 %v2033_v57, %v1881_v7  ;;  %v2076_v14 = vadd.f32 %v2075_v58, %v1913_v10  ;;  %v3503_v58 = vadd.f32 %v1942_v52, %v3446_v62 }
 0x1b2   : > { %v3474_v15 = vadd.f32 %v1950_v59, %v1818_v11  ;;  %v3476_v16 = vadd.f32 %v1992_v60, %v1850_v12  ;;  %v2026_v59 = vrot.slane %v3452_v8, 4 }
 0x1b4   : > { %v1688_v17 = vpop.f32.mrf.mxu2  ;;  %v1768_v18 = vpop.f32.mrf.mxu3 }
 0x1b5   : > { %v1689_v19 = vadd.f32 %v3322_v45, %v1688_v17  ;;  %v1769_v20 = vadd.f32 %v3322_v45, %v1768_v18  ;;  %v1530_v21 = vpop.f32.mrf.mxu0  ;;  %v1610_v22 = vpop.f32.mrf.mxu1  ;;  %v3525_v17 = vadd.f32 %v2026_v59, %v3452_v8 }
 0x1b6   : > { %v1531_v53 = vadd.f32 %v3322_v45, %v1530_v21  ;;  %v1611_v54 = vadd.f32 %v3322_v45, %v1610_v22 }
 0x1b7   : > { %v1882_v23 = vmax.f32 %v1689_v19, 0.0  ;;  %v1914_v24 = vmax.f32 %v1769_v20, 0.0 }
 0x1b8   : > { %v1819_v0 = vmax.f32 %v1531_v53, 0.0  ;;  %v1851_v1 = vmax.f32 %v1611_v54, 0.0 }
 0x1b9   : > { %v2035_v25 = vadd.f32 %v2034_v13, %v1882_v23  ;;  %v2077_v26 = vadd.f32 %v2076_v14, %v1914_v24  ;;  %v1944_v14 = vrot.slane %v3503_v58, 2 }
 0x1ba   : > { %v1952_v19 = vadd.f32 %v3474_v15, %v1819_v0  ;;  %v1994_v20 = vadd.f32 %v3476_v16, %v1851_v1 }
 0x1bc   : > { %v1690_v27 = vpop.f32.mrf.mxu2  ;;  %v1770_v28 = vpop.f32.mrf.mxu3 }
 0x1bd   : > { %v1533_v29 = vpop.f32.mrf.mxu0  ;;  %v1613_v30 = vpop.f32.mrf.mxu1  ;;  %v1691_v56 = vadd.f32 %v3322_v45, %v1690_v27  ;;  %v1771_v57 = vadd.f32 %v3322_v45, %v1770_v28 }
 0x1be   : > { %v1534_v2 = vadd.f32 %v3322_v45, %v1533_v29  ;;  %v1614_v3 = vadd.f32 %v3322_v45, %v1613_v30 }
 0x1bf   : > { %v1883_v10 = vmax.f32 %v1691_v56, 0.0  ;;  %v1915_v11 = vmax.f32 %v1771_v57, 0.0 }
 0x1c0   : > { %v1820_v21 = vmax.f32 %v1534_v2, 0.0  ;;  %v1852_v22 = vmax.f32 %v1614_v3, 0.0 }
 0x1c1   : > { %v2036_v29 = vadd.f32 %v2035_v25, %v1883_v10  ;;  %v2078_v30 = vadd.f32 %v2077_v26, %v1915_v11 }
 0x1c2   : > { %v1995_v52 = vadd.f32 %v1994_v20, %v1852_v22 }
 0x1c4   : > { %v1693_v31 = vpop.f32.mrf.mxu2  ;;  %v1773_v32 = vpop.f32.mrf.mxu3 }
 0x1c5   : > { %v1535_v33 = vpop.f32.mrf.mxu0  ;;  %v1615_v34 = vpop.f32.mrf.mxu1  ;;  %v1694_v62 = vadd.f32 %v3322_v45, %v1693_v31  ;;  %v1774_v7 = vadd.f32 %v3322_v45, %v1773_v32 }
 0x1c6   : > { %v1536_v12 = vadd.f32 %v3322_v45, %v1535_v33  ;;  %v1616_v13 = vadd.f32 %v3322_v45, %v1615_v34 }
 0x1c7   : > { %v1884_v23 = vmax.f32 %v1694_v62, 0.0  ;;  %v1916_v24 = vmax.f32 %v1774_v7, 0.0 }
 0x1c8   : > { %v1821_v8 = vmax.f32 %v1536_v12, 0.0  ;;  %v1853_v31 = vmax.f32 %v1616_v13, 0.0 }
 0x1c9   : > { %v2037_v53 = vadd.f32 %v2036_v29, %v1884_v23  ;;  %v2079_v54 = vadd.f32 %v2078_v30, %v1916_v24 }
 0x1cc   : > { %v1695_v35 = vpop.f32.mrf.mxu2  ;;  %v1775_v36 = vpop.f32.mrf.mxu3 }
 0x1cd   : > { %v1538_v37 = vpop.f32.mrf.mxu0  ;;  %v1618_v38 = vpop.f32.mrf.mxu1  ;;  %v1696_v18 = vadd.f32 %v3322_v45, %v1695_v35  ;;  %v1776_v63 = vadd.f32 %v3322_v45, %v1775_v36  ;;  %v1953_v36 = vadd.f32 %v1952_v19, %v1820_v21 }
 0x1ce   : > { %v1539_v27 = vadd.f32 %v3322_v45, %v1538_v37  ;;  %v1619_v28 = vadd.f32 %v3322_v45, %v1618_v38 }
 0x1cf   : > { %v1885_v32 = vmax.f32 %v1696_v18, 0.0  ;;  %v1917_v33 = vmax.f32 %v1776_v63, 0.0  ;;  %v1954_v57 = vadd.f32 %v1953_v36, %v1821_v8 }
 0x1d0   : > { %v1822_v55 = vmax.f32 %v1539_v27, 0.0  ;;  %v1854_v56 = vmax.f32 %v1619_v28, 0.0 }
 0x1d1   : > { %v2038_v0 = vadd.f32 %v2037_v53, %v1885_v32  ;;  %v2080_v1 = vadd.f32 %v2079_v54, %v1917_v33 }
 0x1d2   : > { %v1955_v10 = vadd.f32 %v1954_v57, %v1822_v55 }
 0x1d4   : > { %v1698_v39 = vpop.f32.mrf.mxu2  ;;  %v1778_v40 = vpop.f32.mrf.mxu3 }
 0x1d5   : > { %v1540_v41 = vpop.f32.mrf.mxu0  ;;  %v1620_v42 = vpop.f32.mrf.mxu1  ;;  %v1699_v34 = vadd.f32 %v3322_v45, %v1698_v39  ;;  %v1779_v15 = vadd.f32 %v3322_v45, %v1778_v40  ;;  %v1996_v39 = vadd.f32 %v1995_v52, %v1853_v31 }
 0x1d6   : > { %v1541_v37 = vadd.f32 %v3322_v45, %v1540_v41  ;;  %v1621_v38 = vadd.f32 %v3322_v45, %v1620_v42 }
 0x1d7   : > { %v1886_v2 = vmax.f32 %v1699_v34, 0.0  ;;  %v1918_v41 = vmax.f32 %v1779_v15, 0.0  ;;  %v1997_v11 = vadd.f32 %v1996_v39, %v1854_v56 }
 0x1d8   : > { %v1823_v3 = vmax.f32 %v1541_v37, 0.0  ;;  %v1855_v42 = vmax.f32 %v1621_v38, 0.0  ;;  %v2854_v37 = vld [vmem:[%s3665_s2] ss:$0 sm:$0xff] }
 0x1d9   : > { %v2081_v19 = vadd.f32 %v2080_v1, %v1918_v41 }
 0x1da   : > { %v1956_v22 = vadd.f32 %v1955_v10, %v1823_v3 }
 0x1dc   : > { %v3480_v43 = vpop.f32.mrf.mxu2  ;;  %v3482_v44 = vpop.f32.mrf.mxu3 }
 0x1dd   : > { %v3484_v46 = vpop.f32.mrf.mxu0  ;;  %v3486_v47 = vpop.f32.mrf.mxu1  ;;  %v1701_v62 = vadd.f32 %v3322_v45, %v3480_v43  ;;  %v1781_v7 = vadd.f32 %v3322_v45, %v3482_v44  ;;  %v2039_v43 = vadd.f32 %v2038_v0, %v1886_v2 }
 0x1de   : > { %v1544_v40 = vadd.f32 %v3322_v45, %v3484_v46  ;;  %v1624_v59 = vadd.f32 %v3322_v45, %v3486_v47 }
 0x1df   : > { %v1887_v23 = vmax.f32 %v1701_v62, 0.0  ;;  %v1919_v24 = vmax.f32 %v1781_v7, 0.0 }
 0x1e0   : > { %v1824_v12 = vmax.f32 %v1544_v40, 0.0  ;;  %v1856_v13 = vmax.f32 %v1624_v59, 0.0 }
 0x1e1   : > { %v2040_v36 = vadd.f32 %v2039_v43, %v1887_v23  ;;  %v2082_v52 = vadd.f32 %v2081_v19, %v1919_v24 }
 0x1e2   : > { %v1957_v8 = vadd.f32 %v1956_v22, %v1824_v12 }
 0x1e4   : > { %v3488_v48 = vpop.f32.mrf.mxu2  ;;  %v3490_v49 = vpop.f32.mrf.mxu3 }
 0x1e5   : > { %v3492_v50 = vpop.f32.mrf.mxu0  ;;  %v3494_v51 = vpop.f32.mrf.mxu1  ;;  %v1704_v18 = vadd.f32 %v3322_v45, %v3488_v48  ;;  %v1784_v63 = vadd.f32 %v3322_v45, %v3490_v49 }
 0x1e6   : > { %v1546_v46 = vadd.f32 %v3322_v45, %v3492_v50  ;;  %v1626_v47 = vadd.f32 %v3322_v45, %v3494_v51  ;;  %v1998_v51 = vadd.f32 %v1997_v11, %v1855_v42 }
 0x1e7   : > { %v1920_v32 = vmax.f32 %v1784_v63, 0.0 }
 0x1e8   : > { %v1825_v48 = vmax.f32 %v1546_v46, 0.0  ;;  %v1857_v29 = vmax.f32 %v1626_v47, 0.0  ;;  %v1999_v31 = vadd.f32 %v1998_v51, %v1856_v13 }
 0x1e9   : > { %v2083_v57 = vadd.f32 %v2082_v52, %v1920_v32 }
 0x1ea   : > { %v2000_v53 = vadd.f32 %v1999_v31, %v1857_v29 }
 0x1ec   : > { %v3506_v60 = vpop.f32.mrf.mxu2  ;;  %v3508_v61 = vpop.f32.mrf.mxu3 }
 0x1ed   : > { %v3512_v4 = vpop.f32.mrf.mxu0  ;;  %v3514_v5 = vpop.f32.mrf.mxu1  ;;  %v1706_v38 = vadd.f32 %v2854_v37, %v3506_v60 }
 0x1ee   : > { %v1549_v44 = vadd.f32 %v3322_v45, %v3512_v4  ;;  %v1629_v20 = vadd.f32 %v3322_v45, %v3514_v5  ;;  %v1888_v4 = vmax.f32 %v1704_v18, 0.0 }
 0x1ef   : > { %v1889_v3 = vmax.f32 %v1706_v38, 0.0 }
 0x1f0   : > { %v1826_v33 = vmax.f32 %v1549_v44, 0.0  ;;  %v1858_v5 = vmax.f32 %v1629_v20, 0.0  ;;  %v2041_v56 = vadd.f32 %v2040_v36, %v1888_v4 }
 0x1f2   : > { %v2001_v59 = vadd.f32 %v2000_v53, %v1858_v5  ;;  %v2042_v44 = vadd.f32 %v2041_v56, %v1889_v3 }
 0x1f4   : > { %v3535_v35 = vpop.f32.mrf.mxu2  ;;  %v3537_v16 = vpop.f32.mrf.mxu3 }
 0x1f5   : > { %v1550_v25 = vpop.f32.mrf.mxu0  ;;  %v1630_v26 = vpop.f32.mrf.mxu1  ;;  %v1709_v39 = vadd.f32 %v2854_v37, %v3535_v35 }
 0x1f6   : > { %v1551_v49 = vadd.f32 %v3322_v45, %v1550_v25  ;;  %v1631_v30 = vadd.f32 %v3322_v45, %v1630_v26  ;;  %v1786_v25 = vadd.f32 %v2854_v37, %v3508_v61  ;;  %v1958_v26 = vadd.f32 %v1957_v8, %v1825_v48 }
 0x1f7   : > { %v1890_v12 = vmax.f32 %v1709_v39, 0.0 }
 0x1f8   : > { %v1827_v54 = vmax.f32 %v1551_v49, 0.0  ;;  %v1859_v55 = vmax.f32 %v1631_v30, 0.0  ;;  %v1959_v40 = vadd.f32 %v1958_v26, %v1826_v33  ;;  %v1921_v60 = vmax.f32 %v1786_v25, 0.0 }
 0x1f9   : > { %v1945_v49 = vadd.f32 %v1944_v14, %v3503_v58  ;;  %v2028_v30 = vrot.slane %v3525_v17, 2 }
 0x1fa   : > { %v1960_v10 = vadd.f32 %v1959_v40, %v1827_v54  ;;  %v2002_v11 = vadd.f32 %v2001_v59, %v1859_v55  ;;  %v2084_v20 = vadd.f32 %v2083_v57, %v1921_v60 }
 0x1fb   : > { %v2029_v56 = vadd.f32 %v2028_v30, %v3525_v17 }
 0x1fc   : > { %v1710_v50 = vpop.f32.mrf.mxu2  ;;  %v1790_v21 = vpop.f32.mrf.mxu3 }
 0x1fd   : > { %v1553_v27 = vpop.f32.mrf.mxu0  ;;  %v1633_v28 = vpop.f32.mrf.mxu1  ;;  %v1711_v42 = vadd.f32 %v2854_v37, %v1710_v50  ;;  %v1791_v61 = vadd.f32 %v2854_v37, %v1790_v21  ;;  %v1986_v50 = vrot.slane %v3517_v6, 2  ;;  %v2068_v21 = vrot.slane %v3454_v9, 4 }
 0x1fe   : > { %v1554_v34 = vadd.f32 %v3322_v45, %v1553_v27  ;;  %v1634_v15 = vadd.f32 %v3322_v45, %v1633_v28  ;;  %v1789_v45 = vadd.f32 %v2854_v37, %v3537_v16  ;;  %v2043_v27 = vadd.f32 %v2042_v44, %v1890_v12 }
 0x1ff   : > { %v1891_v22 = vmax.f32 %v1711_v42, 0.0  ;;  %v1923_v51 = vmax.f32 %v1791_v61, 0.0  ;;  %v1987_v36 = vadd.f32 %v1986_v50, %v3517_v6  ;;  %v2069_v52 = vadd.f32 %v2068_v21, %v3454_v9 }
 0x200   : > { %v1828_v0 = vmax.f32 %v1554_v34, 0.0  ;;  %v1860_v1 = vmax.f32 %v1634_v15, 0.0  ;;  %v1922_v35 = vmax.f32 %v1789_v45, 0.0  ;;  %v1946_v45 = vrot.slane %v1945_v49, 1 }
 0x201   : > { %v2044_v33 = vadd.f32 %v2043_v27, %v1891_v22  ;;  %v2070_v40 = vrot.slane %v2069_v52, 2 }
 0x202   : > { %v1961_v18 = vadd.f32 %v1960_v10, %v1828_v0  ;;  %v2003_v63 = vadd.f32 %v2002_v11, %v1860_v1  ;;  %v2085_v28 = vadd.f32 %v2084_v20, %v1922_v35  ;;  %v1988_v0 = vrot.slane %v1987_v36, 1 }
 0x203   : > { %v1947_v42 = vadd.f32 %v1946_v45, %v1945_v49  ;;  %v2071_v61 = vadd.f32 %v2070_v40, %v2069_v52 }
 0x204   : > { %v1713_v2 = vpop.f32.mrf.mxu2  ;;  %v1793_v41 = vpop.f32.mrf.mxu3  ;;  %v2086_v5 = vadd.f32 %v2085_v28, %v1923_v51  ;;  %v1989_v17 = vadd.f32 %v1988_v0, %v1987_v36  ;;  %v1926_v51 = vld [vmem:[#allocation2] sm:$0xff] }
 0x205   : > { %v1555_v62 = vpop.f32.mrf.mxu0  ;;  %v1635_v7 = vpop.f32.mrf.mxu1  ;;  %v1714_v13 = vadd.f32 %v2854_v37, %v1713_v2  ;;  %v1794_v16 = vadd.f32 %v2854_v37, %v1793_v41  ;;  %v2030_v41 = vrot.slane %v2029_v56, 1 }
 0x206   : > { %v1556_v46 = vadd.f32 %v2854_v37, %v1555_v62  ;;  %v1636_v47 = vadd.f32 %v2854_v37, %v1635_v7 }
 0x207   : > { %v1892_v48 = vmax.f32 %v1714_v13, 0.0  ;;  %v1924_v29 = vmax.f32 %v1794_v16, 0.0  ;;  %v2072_v16 = vrot.slane %v2071_v61, 1 }
 0x208   : > { %v1829_v43 = vmax.f32 %v1556_v46, 0.0  ;;  %v1861_v19 = vmax.f32 %v1636_v47, 0.0  ;;  %v2031_v47 = vadd.f32 %v2030_v41, %v2029_v56 }
 0x209   : > { %v2045_v26 = vadd.f32 %v2044_v33, %v1892_v48  ;;  %v2087_v53 = vadd.f32 %v2086_v5, %v1924_v29  ;;  %v2073_v20 = vadd.f32 %v2072_v16, %v2071_v61 }
 0x20a   : > { %v1962_v23 = vadd.f32 %v1961_v18, %v1829_v43  ;;  %v2004_v24 = vadd.f32 %v2003_v63, %v1861_v19 }
 0x20c   : > { %v1963_v8 = vrot.slane %v1962_v23, 4  ;;  %v2005_v31 = vrot.slane %v2004_v24, 4  ;;  %v1715_v4 = vpop.f32.mrf.mxu2  ;;  %v1795_v32 = vpop.f32.mrf.mxu3 }
 0x20d   : > { %v1716_v34 = vadd.f32 %v2854_v37, %v1715_v4  ;;  %v1796_v15 = vadd.f32 %v2854_v37, %v1795_v32 }
 0x20e   : > { %v1964_v38 = vadd.f32 %v1963_v8, %v1962_v23  ;;  %v2006_v25 = vadd.f32 %v2005_v31, %v2004_v24 }
 0x20f   : > { %v1893_v54 = vmax.f32 %v1716_v34, 0.0  ;;  %v1925_v58 = vmax.f32 %v1796_v15, 0.0 }
 0x210   : > { %v1965_v14 = vrot.slane %v1964_v38, 2  ;;  %v2007_v55 = vrot.slane %v2006_v25, 2 }
 0x211   : > { %v2046_v57 = vadd.f32 %v2045_v26, %v1893_v54  ;;  %v2088_v39 = vadd.f32 %v2087_v53, %v1925_v58 }
 0x212   : > { %v1966_v59 = vadd.f32 %v1965_v14, %v1964_v38  ;;  %v2008_v37 = vadd.f32 %v2007_v55, %v2006_v25 }
 0x213   : > { %v2047_v6 = vrot.slane %v2046_v57, 4  ;;  %v2089_v1 = vrot.slane %v2088_v39, 4 }
 0x214   : > { %v1967_v9 = vrot.slane %v1966_v59, 1  ;;  %v2009_v2 = vrot.slane %v2008_v37, 1 }
 0x215   : > { %v2048_v3 = vadd.f32 %v2047_v6, %v2046_v57  ;;  %v2090_v60 = vadd.f32 %v2089_v1, %v2088_v39 }
 0x216   : > { %v1968_v62 = vadd.f32 %v1967_v9, %v1966_v59  ;;  %v2010_v46 = vadd.f32 %v2009_v2, %v2008_v37 }
 0x217   : > { %v2049_v7 = vrot.slane %v2048_v3, 2  ;;  %v2091_v10 = vrot.slane %v2090_v60, 2 }
 0x218   : > { %v2104_v11 = vsel %vm2103_vm2, %v1968_v62, %v1947_v42 }
 0x219   : > { %v2106_v12 = vsel %vm2105_vm3, %v1989_v17, %v2104_v11  ;;  %v2050_v35 = vadd.f32 %v2049_v7, %v2048_v3  ;;  %v2092_v13 = vadd.f32 %v2091_v10, %v2090_v60 }
 0x21a   : > { %v2108_v18 = vsel %vm2107_vm4, %v2010_v46, %v2106_v12 }
 0x21b   : > { %v2051_v63 = vrot.slane %v2050_v35, 1  ;;  %v2110_v43 = vsel %vm2109_vm5, %v2031_v47, %v2108_v18  ;;  %v2093_v19 = vrot.slane %v2092_v13, 1 }
 0x21d   : > { %v2052_v44 = vadd.f32 %v2051_v63, %v2050_v35  ;;  %v2094_v50 = vadd.f32 %v2093_v19, %v2092_v13 }
 0x21f   : > { %v2112_v22 = vsel %vm2111_vm6, %v2052_v44, %v2110_v43 }
 0x220   : > { %v2114_v21 = vsel %vm2113_vm7, %v2073_v20, %v2112_v22  ;;  %2123 = sbr.rel (%p2644_p4) target bundleno = 715 (0x2cb), region = 89 }
 0x221   : > { %v2116_v23 = vsel %vm2115_vm8, %v2094_v50, %v2114_v21 }
 0x222   : > { %v2118_v24 = vadd.f32 %v2116_v23, %v1926_v51 }
 0x224   : > { %2119 = vst [vmem:[#allocation2] sm:$0xff] %v2118_v24 }
 0x225   : > { %v2755_v27 = vld [vmem:[%s3666_s3 + $0x38] sm:$0xff]  ;;  %v2754_v28 = vld [vmem:[%s3666_s3 + $0x30] sm:$0xff]  ;;  %v2753_v48 = vld [vmem:[%s3666_s3 + $0x28] sm:$0xff] }
 0x226   : > { %2194 = vmatpush.bf16.msra.mxu0 %v2755_v27  ;;  %v2752_v29 = vld [vmem:[%s3666_s3 + $0x20] sm:$0xff]  ;;  %v2751_v49 = vld [vmem:[%s3666_s3 + $0x18] sm:$0xff]  ;;  %v2750_v30 = vld [vmem:[%s3666_s3 + $0x10] sm:$0xff] }
 0x227   : > { %v2749_v8 = vld [vmem:[%s3666_s3 + $0x8] sm:$0xff]  ;;  %v2748_v31 = vld [vmem:[%s3666_s3] sm:$0xff] }
 0x228   : > { %v2855_v33 = vld [vmem:[%s3667_s4] ss:$0 sm:$0xff] }
 0x22a   : > { %2195 = vmatpush.bf16.msra.mxu0 %v2754_v28 }
 0x22b   : > { %v2124_v4 = vld [vmem:[#allocation2] sm:$0xff] }
 0x22c   : > { %v2125_v32 = vpack.c.bf16 %v2124_v4, %v2124_v4 }
 0x22e   : > { %2196 = vmatpush.bf16.msra.mxu0 %v2753_v48 }
 0x232   : > { %2197 = vmatpush.bf16.msra.mxu0 %v2752_v29 }
 0x236   : > { %2198 = vmatpush.bf16.msra.mxu0 %v2751_v49 }
 0x23a   : > { %2199 = vmatpush.bf16.msra.mxu0 %v2750_v30 }
 0x23e   : > { %2200 = vmatpush.bf16.msra.mxu0 %v2749_v8 }
 0x242   : > { %2201 = vmatpush.bf16.msra.mxu0 %v2748_v31 }
 0x245   : > { %2202 = vmatmul.bf16.vlgmr.msra.gmra.mxu0 %v2125_v32 }
 0x2c2   : > { %v2203_v5 = vpop.f32.mrf.mxu0 }
 0x2c3   : > { %v2204_v34 = vadd.f32 %v2855_v33, %v2203_v5 }
 0x2c5   : > { %2207 = vst [vmem:[%s791_s12] sm:$0xff] %v2204_v34 }
 0x2ca   : > { %v2205_v15 = vpop.f32.mrf.mxu0 }
 0x2cb PF: > { %s2678_s21 = sshll.u32 %s2954_s24, 3  ;;  %s2221_s28 = sshll.u32 %s791_s12, 4  ;;  %s2222_s28 = int_to_ptr.vmem [resolvable:$true] %s2221_s28 }
 0x2cc   : > { %s2219_s6 = scalar_lea.hbm %s3668_s5, %s2678_s21  ;;  %s2209_s8 = scalar_lea.sflag [#allocation5], %s789_s17 }
 0x2cd   : > { %s2223_s13 = sshll.u32 %s2219_s6, 4  ;;  %s2876_s1 = scalar_lea.hbm %s3668_s5, 16  ;;  %s2224_s13 = int_to_ptr.hbm [resolvable:$true] %s2223_s13 }
 0x2ce   : > { %s2870_s10 = sshra.s32 %s2224_s13, 4  ;;  %s2871_s10 = int_to_ptr.hbm [resolvable:$true] %s2870_s10 }
 0x2cf   : > { %s2872_s23 = scalar_lea.hbm %s2871_s10, 8  ;;  %p2877_p9 = scmp.lt.s32.totalorder %s2871_s10, %s3668_s5 }
 0x2d0   : > { %p2873_p5 = scmp.ne.s32.totalorder %s2871_s10, %s2872_s23  ;;  %p2878_p10 = scmp.lt.s32.totalorder %s2876_s1, %s2872_s23 }
 0x2d2   : > { %p2874_p6 = pnand %p2873_p5, %p3071_p7  ;;  %p2879_p11 = por %p2878_p10, %p2877_p9 }
 0x2d4   : > { %p2875_p8 = pneg %p2874_p6 }
 0x2d6   : > { %p2880_p13 = pnand %p2879_p11, %p2875_p8 }
 0x2d8   : > { %2883 = shalt.err (!%p2880_p13)
}
 0x2d9   : > { %2765 = dma.vmem_to_hbm [thread:$0]  (%p3071_p7), %s2222_s28, 128, %s2224_s13, %s2209_s8  }
 0x2da PF: > { %p2771_p0 = scmp.ge.s32.totalorder %s2966_s27, 2  ;;  %s2235_s17 = sand.u32 1, %s2930_s18  }
 0x2db   : > { %s2236_s0 = scalar_lea.sflag [#allocation5], %s2235_s17 }
 0x2dc   : > { %p2768_p1 = pnand %p2771_p0, %p3079_p12 }
 0x2de   : > { %p2769_p2 = pneg %p2768_p1 }
 0x2e0   : > { %2925 = dma.done.wait (%p2769_p2), %s2236_s0, 128  }
 0x2e1   : > { %2927 = vsyncadd (%p2769_p2), %s2236_s0, 4294967168  ;;  %s18_s27 = sadd.s32 1, %s2966_s27   ;;  %s3678_s1 = sld [smem:[#allocation7_spill]] }
 0x2e2   : > { %p15_p3 = scmp.ge.s32.totalorder %s18_s27, 6   ;;  %s3679_s18 = smov %s2934_s19 }
 0x2e3   : > { %s3680_s19 = smov %s2938_s20  ;;  %s3681_s20 = smov %s3084_s15 }
 0x2e4   : > { %s3682_s21 = smov %s2946_s22  ;;  %s3683_s22 = smov %s3087_s16 }
 0x2e5   : > { %s3684_s23 = smov %s2958_s25  ;;  %s3685_s24 = smov %s2962_s26 }
 0x2e6   : > { %s3686_s25 = smov %s3689_s30  ;;  %17 = sbr.rel (!%p15_p3) target bundleno = 9 (0x9), region = 129 }
 0x2e7   : > { %s3687_s26 = smov %s3678_s1 }
 0x2eb   :  { %2242 = vsyncpa [#allocation5], 1 }
 0x2ec   :  { %2244 = vsyncpa [#allocation5 + $0x1], 1 }

</bundles_post_ra>
